<compile_context>
chip_gen: v6e
topology: v6e:2x2x1
jax: 0.10.0
libtpu: 0.0.40
codegen_flags: <defaults>
</compile_context>

<pallas_src>
import functools

import numpy as np
import jax
import jax.numpy as jnp
from jax.experimental import pallas as pl
from jax.experimental.pallas import tpu as pltpu

_EPS = 1e-5                         # nn.BatchNorm2d default eps
_EXACT = jax.lax.Precision.HIGHEST  # only for the tiny per-channel BN matmuls


# --------------------------------- kernel body ---------------------------------
def _bn_slab(slab, gamma, beta, reduce_t, expand, count):
  """Training-mode BatchNorm on a lane-folded (M, W*C) slab.

  slab      : (M, W*C) f32, lane index = x*C + c
  gamma/beta: (1, C) f32
  reduce_t  : (W*C, C) 0/1 lane->channel fold matrix
  expand    : (C, W*C) 0/1 channel->lane matrix (= reduce_t.T)
  count     : N*H*W elements per channel
  """
  colsum = jnp.sum(slab, axis=0, keepdims=True)              # (1, W*C)
  colsq = jnp.sum(slab * slab, axis=0, keepdims=True)        # (1, W*C)
  stats = jnp.concatenate([colsum, colsq], axis=0)           # (2, W*C)
  ch = jnp.dot(stats, reduce_t, preferred_element_type=jnp.float32,
               precision=_EXACT)                             # (2, C): [sum; sum_sq]
  mean = ch[0:1, :] / count
  # one-pass variance; clamp guards against tiny negative rounding -> rsqrt NaN
  var = jnp.maximum(ch[1:2, :] / count - mean * mean, 0.0)
  scale = gamma * jax.lax.rsqrt(var + _EPS)                  # (1, C)
  shift = beta - mean * scale                                # (1, C)
  ss = jnp.concatenate([scale, shift], axis=0)               # (2, C)
  ss_l = jnp.dot(ss, expand, preferred_element_type=jnp.float32,
                 precision=_EXACT)                           # (2, W*C)
  return slab * ss_l[0:1, :] + ss_l[1:2, :]                  # fused scale/shift


def _conv3x3_slab(slab, w_ref, not_top, not_bot, band_k):
  """3x3 SAME conv on a (M, W*Cin) slab -> (M, W*Cout).

  w_ref: (3*W*Cin, W*Cout) bf16 banded weights: rows [0:K) couple input row y-1,
  [K:2K) row y, [2K:3K) row y+1 (W-direction taps + zero padding baked into bands).
  Vertical shifts via pltpu.roll (XLU) + image-boundary masks (zero top/bottom rows).
  """
  m = slab.shape[0]
  dn = pltpu.roll(slab, shift=1, axis=0) * not_top        # row y holds input row y-1
  up = pltpu.roll(slab, shift=m - 1, axis=0) * not_bot    # row y holds input row y+1
  if band_k % 128 == 0:
    # K-stacked single MXU matmul (K = 3*W*Cin); concat offsets are lane-aligned.
    lhs = jnp.concatenate([dn, slab, up], axis=1).astype(jnp.bfloat16)
    return jnp.dot(lhs, w_ref[...], preferred_element_type=jnp.float32)
  # unaligned band width: keep 3 separate bf16 matmuls (fine on v5e's 128-deep MXU)
  acc = jnp.dot(dn.astype(jnp.bfloat16), w_ref[0:band_k, :],
                preferred_element_type=jnp.float32)
  acc = acc + jnp.dot(slab.astype(jnp.bfloat16), w_ref[band_k:2 * band_k, :],
                      preferred_element_type=jnp.float32)
  acc = acc + jnp.dot(up.astype(jnp.bfloat16), w_ref[2 * band_k:3 * band_k, :],
                      preferred_element_type=jnp.float32)
  return acc


def _double_conv_kernel(
    x_ref, w1_ref, w2_ref, bn_ref, mask_ref,
    r_in_ref, e_in_ref, r_out_ref, e_out_ref,
    o_ref, *, W, Ci, Co):
  M = x_ref.shape[0]
  count = float(M * W)                       # = N*H*W elements per channel
  not_top = mask_ref[:, 0:1]                 # (M, 1): 0 on each image's top row
  not_bot = mask_ref[:, 1:2]                 # (M, 1): 0 on each image's bottom row

  bn = bn_ref[...]                           # (6, max(Ci, Co)) packed gammas / betas
  g0, b0 = bn[0:1, :Ci], bn[1:2, :Ci]
  g1, b1 = bn[2:3, :Co], bn[3:4, :Co]
  g2, b2 = bn[4:5, :Co], bn[5:6, :Co]
  r_in, e_in = r_in_ref[...], e_in_ref[...]
  r_out, e_out = r_out_ref[...], e_out_ref[...]

  # ---- BatchNorm2d(Ci) ----
  h = _bn_slab(x_ref[...], g0, b0, r_in, e_in, count)
  # ---- Conv2d(Ci -> Co, 3x3, pad 1); bias folded away (training-mode BN re-centres) ----
  y = _conv3x3_slab(h, w1_ref, not_top, not_bot, W * Ci)
  # ---- BatchNorm2d(Co) + ReLU ----
  y = jnp.maximum(_bn_slab(y, g1, b1, r_out, e_out, count), 0.0)
  # ---- Conv2d(Co -> Co, 3x3, pad 1) ----
  z = _conv3x3_slab(y, w2_ref, not_top, not_bot, W * Co)
  # ---- BatchNorm2d(Co) + ReLU ----
  z = jnp.maximum(_bn_slab(z, g2, b2, r_out, e_out, count), 0.0)

  o_ref[...] = z                             # (M, W*Co): lane-dense (128-lane) store


# --------------------------- one-time constant prep ----------------------------
def _banded_weight(w_hwio, W):
  """(3, 3, Cin, Cout) HWIO -> (3*W*Cin, W*Cout) block-banded bf16 matrix.

  Rows [ky*W*Cin + x_in*Cin + ci, x_out*Cout + co] = w[ky, x_in - x_out + 1, ci, co]
  (else 0), so a row-shifted slab @ band applies the 3 horizontal taps of kernel row ky
  with W-direction SAME padding baked in.
  """
  cin, cout = w_hwio.shape[2], w_hwio.shape[3]
  mats = []
  for ky in range(3):
    m = jnp.zeros((W * cin, W * cout), jnp.float32)
    for kx in range(3):
      shift = jnp.eye(W, W, k=1 - kx, dtype=jnp.float32)   # x_in = x_out + kx - 1
      m = m + jnp.kron(shift, w_hwio[ky, kx].astype(jnp.float32))
    mats.append(m)
  return jnp.concatenate(mats, axis=0).astype(jnp.bfloat16)


def prepare_constants(params, N, H, W):
  """Build every kernel constant exactly once (hoisted out of the hot path)."""
  Ci = params["w1"].shape[2]
  Co = params["w1"].shape[3]
  Cmax = max(Ci, Co)
  M = N * H

  # packed BN gammas / betas: one (6, Cmax) f32 slab
  bn = np.zeros((6, Cmax), np.float32)
  bn[0, :Ci] = np.asarray(params["bn0_gamma"]); bn[1, :Ci] = np.asarray(params["bn0_beta"])
  bn[2, :Co] = np.asarray(params["bn1_gamma"]); bn[3, :Co] = np.asarray(params["bn1_beta"])
  bn[4, :Co] = np.asarray(params["bn2_gamma"]); bn[5, :Co] = np.asarray(params["bn2_beta"])

  # image-boundary masks for the vertical rolls, packed into one (M, 2) slab
  ys = np.arange(M) % H
  masks = np.stack([(ys != 0), (ys != H - 1)], axis=1).astype(np.float32)

  # per-channel <-> lane fold matrices for BN on lane-folded slabs
  def fold_mats(c):
    expand = np.tile(np.eye(c, dtype=np.float32), (1, W))   # (c, W*c)
    return np.ascontiguousarray(expand.T), expand           # reduce (W*c, c), expand

  r_in, e_in = fold_mats(Ci)
  r_out, e_out = fold_mats(Co)

  return dict(
      w1b=_banded_weight(params["w1"], W),                  # (3*W*Ci, W*Co) bf16
      w2b=_banded_weight(params["w2"], W),                  # (3*W*Co, W*Co) bf16
      bn=jnp.asarray(bn), masks=jnp.asarray(masks),
      r_in=jnp.asarray(r_in), e_in=jnp.asarray(e_in),
      r_out=jnp.asarray(r_out), e_out=jnp.asarray(e_out),
  )


# --------------------------------- host wrapper ---------------------------------
@jax.jit
def double_conv_pallas(x_nchw, consts):
  """x_nchw: (N, Ci, H, W) float32 (PyTorch convention). Returns NCHW output."""
  N, Ci, H, W = x_nchw.shape
  Co = consts["w2b"].shape[1] // W
  M = N * H

  # lane-folded activation slab: row = (n, y), lane = x*Ci + ci
  x_slab = jnp.transpose(x_nchw, (0, 2, 3, 1)).reshape(M, W * Ci).astype(jnp.float32)

  kernel = functools.partial(_double_conv_kernel, W=W, Ci=Ci, Co=Co)
  vmem = pl.BlockSpec(memory_space=pltpu.MemorySpace.VMEM)
  inputs = (x_slab, consts["w1b"], consts["w2b"], consts["bn"], consts["masks"],
            consts["r_in"], consts["e_in"], consts["r_out"], consts["e_out"])

  out_slab = pl.pallas_call(
      kernel,
      out_shape=jax.ShapeDtypeStruct((M, W * Co), jnp.float32),   # lane-dense output
      in_specs=[vmem] * len(inputs),
      out_specs=vmem,
      compiler_params=pltpu.CompilerParams(vmem_limit_bytes=16 * 1024 * 1024),
  )(*inputs)

  out = out_slab.reshape(N, H, W, Co)                             # layout-only reshape
  return jnp.transpose(out, (0, 3, 1, 2))                         # NHWC -> NCHW


# ------------------------- deterministic parameter init -------------------------
def init_params(key, ci, co):
  k1, k2, k3, k4 = jax.random.split(key, 4)
  bound1 = 1.0 / np.sqrt(ci * 9)
  bound2 = 1.0 / np.sqrt(co * 9)
  return {
      # BatchNorm2d defaults: weight=1, bias=0
      "bn0_gamma": jnp.ones((ci,), jnp.float32),
      "bn0_beta": jnp.zeros((ci,), jnp.float32),
      # Conv weights in HWIO layout (== PyTorch (O,I,3,3) transposed to (3,3,I,O))
      "w1": jax.random.uniform(k1, (3, 3, ci, co), jnp.float32, -bound1, bound1),
      "b1": jax.random.uniform(k2, (co,), jnp.float32, -bound1, bound1),
      "bn1_gamma": jnp.ones((co,), jnp.float32),
      "bn1_beta": jnp.zeros((co,), jnp.float32),
      "w2": jax.random.uniform(k3, (3, 3, co, co), jnp.float32, -bound2, bound2),
      "b2": jax.random.uniform(k4, (co,), jnp.float32, -bound2, bound2),
      "bn2_gamma": jnp.ones((co,), jnp.float32),
      "bn2_beta": jnp.zeros((co,), jnp.float32),
  }


# ------------------------------ plain-JAX reference ------------------------------
def _bn_ref(x, g, b):
  m = jnp.mean(x, axis=(0, 1, 2), keepdims=True)
  v = jnp.mean((x - m) ** 2, axis=(0, 1, 2), keepdims=True)
  return (x - m) * jax.lax.rsqrt(v + _EPS) * g.reshape(1, 1, 1, -1) + b.reshape(1, 1, 1, -1)


def _conv_ref(x, w):
  # Same bf16-operand / f32-accumulate contract as the kernel's MXU matmuls.
  return jax.lax.conv_general_dilated(
      x.astype(jnp.bfloat16), w.astype(jnp.bfloat16), (1, 1), "SAME",
      dimension_numbers=("NHWC", "HWIO", "NHWC"),
      preferred_element_type=jnp.float32)


def double_conv_ref(x_nchw, p):
  x = jnp.transpose(x_nchw, (0, 2, 3, 1)).astype(jnp.float32)
  h = _bn_ref(x, p["bn0_gamma"], p["bn0_beta"])
  # Reference keeps the conv bias; the kernel folds it into the following training-mode
  # BatchNorm (mathematically identical), so the outputs must still agree.
  h = _conv_ref(h, p["w1"]) + p["b1"].reshape(1, 1, 1, -1)
  h = jnp.maximum(_bn_ref(h, p["bn1_gamma"], p["bn1_beta"]), 0.0)
  h = _conv_ref(h, p["w2"]) + p["b2"].reshape(1, 1, 1, -1)
  h = jnp.maximum(_bn_ref(h, p["bn2_gamma"], p["bn2_beta"]), 0.0)
  return jnp.transpose(h, (0, 3, 1, 2))


if __name__ == "__main__":
  key = jax.random.PRNGKey(0)
  kx, kp = jax.random.split(key)

  N, Ci, H, W = 2, 4, 16, 16        # PyTorch NCHW input shape
  Co = 8                            # out_channels  (W*Co = 128 -> exactly one lane tile)

  x = jax.random.normal(kx, (N, Ci, H, W), jnp.float32)
  params = init_params(kp, Ci, Co)
  consts = prepare_constants(params, N, H, W)   # built once, off the hot path

  out = jax.block_until_ready(double_conv_pallas(x, consts))
  ref = jax.block_until_ready(double_conv_ref(x, params))

  # Both paths use bf16 MXU operands with f32 accumulation; tolerance sized accordingly
  # (a layout/indexing bug would produce O(1) errors, so the check remains meaningful).
  np.testing.assert_allclose(np.asarray(out), np.asarray(ref), rtol=1e-2, atol=1e-2)

  print("KERNEL_OK")
</pallas_src>

<mosaic_0001>
module attributes {stable_mosaic.version = 11 : i64} {
  func.func @_double_conv_kernel(%arg0: memref<32x64xf32, #tpu.memory_space<vmem>>, %arg1: memref<192x128xbf16, #tpu.memory_space<vmem>>, %arg2: memref<384x128xbf16, #tpu.memory_space<vmem>>, %arg3: memref<6x8xf32, #tpu.memory_space<vmem>>, %arg4: memref<32x2xf32, #tpu.memory_space<vmem>>, %arg5: memref<64x4xf32, #tpu.memory_space<vmem>>, %arg6: memref<4x64xf32, #tpu.memory_space<vmem>>, %arg7: memref<128x8xf32, #tpu.memory_space<vmem>>, %arg8: memref<8x128xf32, #tpu.memory_space<vmem>>, %arg9: memref<32x128xf32, #tpu.memory_space<vmem>>) attributes {dimension_semantics = [], scalar_prefetch = 0 : i64, scratch_operands = 0 : i64, tpu.core_type = #tpu.core_type<tc>} {
    %c0 = arith.constant 0 : index
    %c0_0 = arith.constant 0 : index
    %0 = vector.load %arg4[%c0, %c0_0] : memref<32x2xf32, #tpu.memory_space<vmem>>, vector<32x1xf32>
    %c0_1 = arith.constant 0 : index
    %c1 = arith.constant 1 : index
    %1 = vector.load %arg4[%c0_1, %c1] : memref<32x2xf32, #tpu.memory_space<vmem>>, vector<32x1xf32>
    %c0_2 = arith.constant 0 : index
    %c0_3 = arith.constant 0 : index
    %2 = vector.load %arg3[%c0_2, %c0_3] : memref<6x8xf32, #tpu.memory_space<vmem>>, vector<6x8xf32>
    %3 = vector.extract_strided_slice %2 {offsets = [0, 0], sizes = [1, 4], strides = [1, 1]} : vector<6x8xf32> to vector<1x4xf32>
    %4 = vector.extract_strided_slice %2 {offsets = [1, 0], sizes = [1, 4], strides = [1, 1]} : vector<6x8xf32> to vector<1x4xf32>
    %5 = vector.extract_strided_slice %2 {offsets = [2, 0], sizes = [1, 8], strides = [1, 1]} : vector<6x8xf32> to vector<1x8xf32>
    %6 = vector.extract_strided_slice %2 {offsets = [3, 0], sizes = [1, 8], strides = [1, 1]} : vector<6x8xf32> to vector<1x8xf32>
    %7 = vector.extract_strided_slice %2 {offsets = [4, 0], sizes = [1, 8], strides = [1, 1]} : vector<6x8xf32> to vector<1x8xf32>
    %8 = vector.extract_strided_slice %2 {offsets = [5, 0], sizes = [1, 8], strides = [1, 1]} : vector<6x8xf32> to vector<1x8xf32>
    %c0_4 = arith.constant 0 : index
    %c0_5 = arith.constant 0 : index
    %9 = vector.load %arg5[%c0_4, %c0_5] : memref<64x4xf32, #tpu.memory_space<vmem>>, vector<64x4xf32>
    %c0_6 = arith.constant 0 : index
    %c0_7 = arith.constant 0 : index
    %10 = vector.load %arg6[%c0_6, %c0_7] : memref<4x64xf32, #tpu.memory_space<vmem>>, vector<4x64xf32>
    %c0_8 = arith.constant 0 : index
    %c0_9 = arith.constant 0 : index
    %11 = vector.load %arg7[%c0_8, %c0_9] : memref<128x8xf32, #tpu.memory_space<vmem>>, vector<128x8xf32>
    %c0_10 = arith.constant 0 : index
    %c0_11 = arith.constant 0 : index
    %12 = vector.load %arg8[%c0_10, %c0_11] : memref<8x128xf32, #tpu.memory_space<vmem>>, vector<8x128xf32>
    %c0_12 = arith.constant 0 : index
    %c0_13 = arith.constant 0 : index
    %13 = vector.load %arg0[%c0_12, %c0_13] : memref<32x64xf32, #tpu.memory_space<vmem>>, vector<32x64xf32>
    %cst = arith.constant dense<0.000000e+00> : vector<64xf32>
    %14 = vector.multi_reduction <add>, %13, %cst [0] : vector<32x64xf32> to vector<64xf32>
    %15 = vector.shape_cast %14 : vector<64xf32> to vector<1x64xf32>
    %16 = arith.mulf %13, %13 : vector<32x64xf32>
    %cst_14 = arith.constant dense<0.000000e+00> : vector<64xf32>
    %17 = vector.multi_reduction <add>, %16, %cst_14 [0] : vector<32x64xf32> to vector<64xf32>
    %18 = vector.shape_cast %17 : vector<64xf32> to vector<1x64xf32>
    %19 = tpu.concatenate %15, %18 in 0 : vector<1x64xf32>, vector<1x64xf32> -> vector<2x64xf32>
    %cst_15 = arith.constant dense<0.000000e+00> : vector<2x4xf32>
    %20 = tpu.matmul %19, %9, %cst_15 {dimension_numbers = #tpu.dot_dimension_numbers<[1], [0], [0], [1], [0, 0, 1, 1], [], []>, precision = #tpu.contract_precision<fp32>} : vector<2x64xf32>, vector<64x4xf32>, vector<2x4xf32> -> vector<2x4xf32>
    %21 = vector.extract_strided_slice %20 {offsets = [0, 0], sizes = [1, 4], strides = [1, 1]} : vector<2x4xf32> to vector<1x4xf32>
    %cst_16 = arith.constant 5.120000e+02 : f32
    %22 = vector.broadcast %cst_16 : f32 to vector<1x4xf32>
    %23 = arith.divf %21, %22 : vector<1x4xf32>
    %24 = vector.extract_strided_slice %20 {offsets = [1, 0], sizes = [1, 4], strides = [1, 1]} : vector<2x4xf32> to vector<1x4xf32>
    %cst_17 = arith.constant 5.120000e+02 : f32
    %25 = vector.broadcast %cst_17 : f32 to vector<1x4xf32>
    %26 = arith.divf %24, %25 : vector<1x4xf32>
    %27 = arith.mulf %23, %23 : vector<1x4xf32>
    %28 = arith.subf %26, %27 : vector<1x4xf32>
    %cst_18 = arith.constant 0.000000e+00 : f32
    %29 = vector.broadcast %cst_18 : f32 to vector<1x4xf32>
    %30 = arith.maximumf %28, %29 : vector<1x4xf32>
    %cst_19 = arith.constant 9.99999974E-6 : f32
    %31 = vector.broadcast %cst_19 : f32 to vector<1x4xf32>
    %32 = arith.addf %30, %31 : vector<1x4xf32>
    %33 = math.rsqrt %32 : vector<1x4xf32>
    %34 = arith.mulf %3, %33 : vector<1x4xf32>
    %35 = arith.mulf %23, %34 : vector<1x4xf32>
    %36 = arith.subf %4, %35 : vector<1x4xf32>
    %37 = tpu.concatenate %34, %36 in 0 : vector<1x4xf32>, vector<1x4xf32> -> vector<2x4xf32>
    %cst_20 = arith.constant dense<0.000000e+00> : vector<2x64xf32>
    %38 = tpu.matmul %37, %10, %cst_20 {dimension_numbers = #tpu.dot_dimension_numbers<[1], [0], [0], [1], [0, 0, 1, 1], [], []>, precision = #tpu.contract_precision<fp32>} : vector<2x4xf32>, vector<4x64xf32>, vector<2x64xf32> -> vector<2x64xf32>
    %39 = vector.extract_strided_slice %38 {offsets = [0, 0], sizes = [1, 64], strides = [1, 1]} : vector<2x64xf32> to vector<1x64xf32>
    %40 = vector.broadcast %39 : vector<1x64xf32> to vector<32x64xf32>
    %41 = arith.mulf %13, %40 : vector<32x64xf32>
    %42 = vector.extract_strided_slice %38 {offsets = [1, 0], sizes = [1, 64], strides = [1, 1]} : vector<2x64xf32> to vector<1x64xf32>
    %43 = vector.broadcast %42 : vector<1x64xf32> to vector<32x64xf32>
    %44 = arith.addf %41, %43 : vector<32x64xf32>
    %c1_i32 = arith.constant 1 : i32
    %45 = tpu.dynamic_rotate %44 by %c1_i32 dim 0 : vector<32x64xf32>, i32 -> vector<32x64xf32>
    %46 = vector.broadcast %0 : vector<32x1xf32> to vector<32x64xf32>
    %47 = arith.mulf %45, %46 : vector<32x64xf32>
    %c31_i32 = arith.constant 31 : i32
    %48 = tpu.dynamic_rotate %44 by %c31_i32 dim 0 : vector<32x64xf32>, i32 -> vector<32x64xf32>
    %49 = vector.broadcast %1 : vector<32x1xf32> to vector<32x64xf32>
    %50 = arith.mulf %48, %49 : vector<32x64xf32>
    %51 = arith.truncf %47 : vector<32x64xf32> to vector<32x64xbf16>
    %c0_21 = arith.constant 0 : index
    %c0_22 = arith.constant 0 : index
    %52 = vector.load %arg1[%c0_21, %c0_22] : memref<192x128xbf16, #tpu.memory_space<vmem>>, vector<64x128xbf16>
    %cst_23 = arith.constant dense<0.000000e+00> : vector<32x128xf32>
    %53 = tpu.matmul %51, %52, %cst_23 {dimension_numbers = #tpu.dot_dimension_numbers<[1], [0], [0], [1], [0, 0, 1, 1], [], []>} : vector<32x64xbf16>, vector<64x128xbf16>, vector<32x128xf32> -> vector<32x128xf32>
    %54 = arith.truncf %44 : vector<32x64xf32> to vector<32x64xbf16>
    %c64 = arith.constant 64 : index
    %c0_24 = arith.constant 0 : index
    %55 = vector.load %arg1[%c64, %c0_24] : memref<192x128xbf16, #tpu.memory_space<vmem>>, vector<64x128xbf16>
    %cst_25 = arith.constant dense<0.000000e+00> : vector<32x128xf32>
    %56 = tpu.matmul %54, %55, %cst_25 {dimension_numbers = #tpu.dot_dimension_numbers<[1], [0], [0], [1], [0, 0, 1, 1], [], []>} : vector<32x64xbf16>, vector<64x128xbf16>, vector<32x128xf32> -> vector<32x128xf32>
    %57 = arith.addf %53, %56 : vector<32x128xf32>
    %58 = arith.truncf %50 : vector<32x64xf32> to vector<32x64xbf16>
    %c128 = arith.constant 128 : index
    %c0_26 = arith.constant 0 : index
    %59 = vector.load %arg1[%c128, %c0_26] : memref<192x128xbf16, #tpu.memory_space<vmem>>, vector<64x128xbf16>
    %cst_27 = arith.constant dense<0.000000e+00> : vector<32x128xf32>
    %60 = tpu.matmul %58, %59, %cst_27 {dimension_numbers = #tpu.dot_dimension_numbers<[1], [0], [0], [1], [0, 0, 1, 1], [], []>} : vector<32x64xbf16>, vector<64x128xbf16>, vector<32x128xf32> -> vector<32x128xf32>
    %61 = arith.addf %57, %60 : vector<32x128xf32>
    %cst_28 = arith.constant dense<0.000000e+00> : vector<128xf32>
    %62 = vector.multi_reduction <add>, %61, %cst_28 [0] : vector<32x128xf32> to vector<128xf32>
    %63 = vector.shape_cast %62 : vector<128xf32> to vector<1x128xf32>
    %64 = arith.mulf %61, %61 : vector<32x128xf32>
    %cst_29 = arith.constant dense<0.000000e+00> : vector<128xf32>
    %65 = vector.multi_reduction <add>, %64, %cst_29 [0] : vector<32x128xf32> to vector<128xf32>
    %66 = vector.shape_cast %65 : vector<128xf32> to vector<1x128xf32>
    %67 = tpu.concatenate %63, %66 in 0 : vector<1x128xf32>, vector<1x128xf32> -> vector<2x128xf32>
    %cst_30 = arith.constant dense<0.000000e+00> : vector<2x8xf32>
    %68 = tpu.matmul %67, %11, %cst_30 {dimension_numbers = #tpu.dot_dimension_numbers<[1], [0], [0], [1], [0, 0, 1, 1], [], []>, precision = #tpu.contract_precision<fp32>} : vector<2x128xf32>, vector<128x8xf32>, vector<2x8xf32> -> vector<2x8xf32>
    %69 = vector.extract_strided_slice %68 {offsets = [0, 0], sizes = [1, 8], strides = [1, 1]} : vector<2x8xf32> to vector<1x8xf32>
    %cst_31 = arith.constant 5.120000e+02 : f32
    %70 = vector.broadcast %cst_31 : f32 to vector<1x8xf32>
    %71 = arith.divf %69, %70 : vector<1x8xf32>
    %72 = vector.extract_strided_slice %68 {offsets = [1, 0], sizes = [1, 8], strides = [1, 1]} : vector<2x8xf32> to vector<1x8xf32>
    %cst_32 = arith.constant 5.120000e+02 : f32
    %73 = vector.broadcast %cst_32 : f32 to vector<1x8xf32>
    %74 = arith.divf %72, %73 : vector<1x8xf32>
    %75 = arith.mulf %71, %71 : vector<1x8xf32>
    %76 = arith.subf %74, %75 : vector<1x8xf32>
    %cst_33 = arith.constant 0.000000e+00 : f32
    %77 = vector.broadcast %cst_33 : f32 to vector<1x8xf32>
    %78 = arith.maximumf %76, %77 : vector<1x8xf32>
    %cst_34 = arith.constant 9.99999974E-6 : f32
    %79 = vector.broadcast %cst_34 : f32 to vector<1x8xf32>
    %80 = arith.addf %78, %79 : vector<1x8xf32>
    %81 = math.rsqrt %80 : vector<1x8xf32>
    %82 = arith.mulf %5, %81 : vector<1x8xf32>
    %83 = arith.mulf %71, %82 : vector<1x8xf32>
    %84 = arith.subf %6, %83 : vector<1x8xf32>
    %85 = tpu.concatenate %82, %84 in 0 : vector<1x8xf32>, vector<1x8xf32> -> vector<2x8xf32>
    %cst_35 = arith.constant dense<0.000000e+00> : vector<2x128xf32>
    %86 = tpu.matmul %85, %12, %cst_35 {dimension_numbers = #tpu.dot_dimension_numbers<[1], [0], [0], [1], [0, 0, 1, 1], [], []>, precision = #tpu.contract_precision<fp32>} : vector<2x8xf32>, vector<8x128xf32>, vector<2x128xf32> -> vector<2x128xf32>
    %87 = vector.extract_strided_slice %86 {offsets = [0, 0], sizes = [1, 128], strides = [1, 1]} : vector<2x128xf32> to vector<1x128xf32>
    %88 = vector.broadcast %87 : vector<1x128xf32> to vector<32x128xf32>
    %89 = arith.mulf %61, %88 : vector<32x128xf32>
    %90 = vector.extract_strided_slice %86 {offsets = [1, 0], sizes = [1, 128], strides = [1, 1]} : vector<2x128xf32> to vector<1x128xf32>
    %91 = vector.broadcast %90 : vector<1x128xf32> to vector<32x128xf32>
    %92 = arith.addf %89, %91 : vector<32x128xf32>
    %cst_36 = arith.constant 0.000000e+00 : f32
    %93 = vector.broadcast %cst_36 : f32 to vector<32x128xf32>
    %94 = arith.maximumf %92, %93 : vector<32x128xf32>
    %c1_i32_37 = arith.constant 1 : i32
    %95 = tpu.dynamic_rotate %94 by %c1_i32_37 dim 0 : vector<32x128xf32>, i32 -> vector<32x128xf32>
    %96 = vector.broadcast %0 : vector<32x1xf32> to vector<32x128xf32>
    %97 = arith.mulf %95, %96 : vector<32x128xf32>
    %c31_i32_38 = arith.constant 31 : i32
    %98 = tpu.dynamic_rotate %94 by %c31_i32_38 dim 0 : vector<32x128xf32>, i32 -> vector<32x128xf32>
    %99 = vector.broadcast %1 : vector<32x1xf32> to vector<32x128xf32>
    %100 = arith.mulf %98, %99 : vector<32x128xf32>
    %101 = tpu.concatenate %97, %94, %100 in 1 : vector<32x128xf32>, vector<32x128xf32>, vector<32x128xf32> -> vector<32x384xf32>
    %102 = arith.truncf %101 : vector<32x384xf32> to vector<32x384xbf16>
    %c0_39 = arith.constant 0 : index
    %c0_40 = arith.constant 0 : index
    %103 = vector.load %arg2[%c0_39, %c0_40] : memref<384x128xbf16, #tpu.memory_space<vmem>>, vector<384x128xbf16>
    %cst_41 = arith.constant dense<0.000000e+00> : vector<32x128xf32>
    %104 = tpu.matmul %102, %103, %cst_41 {dimension_numbers = #tpu.dot_dimension_numbers<[1], [0], [0], [1], [0, 0, 1, 1], [], []>} : vector<32x384xbf16>, vector<384x128xbf16>, vector<32x128xf32> -> vector<32x128xf32>
    %cst_42 = arith.constant dense<0.000000e+00> : vector<128xf32>
    %105 = vector.multi_reduction <add>, %104, %cst_42 [0] : vector<32x128xf32> to vector<128xf32>
    %106 = vector.shape_cast %105 : vector<128xf32> to vector<1x128xf32>
    %107 = arith.mulf %104, %104 : vector<32x128xf32>
    %cst_43 = arith.constant dense<0.000000e+00> : vector<128xf32>
    %108 = vector.multi_reduction <add>, %107, %cst_43 [0] : vector<32x128xf32> to vector<128xf32>
    %109 = vector.shape_cast %108 : vector<128xf32> to vector<1x128xf32>
    %110 = tpu.concatenate %106, %109 in 0 : vector<1x128xf32>, vector<1x128xf32> -> vector<2x128xf32>
    %cst_44 = arith.constant dense<0.000000e+00> : vector<2x8xf32>
    %111 = tpu.matmul %110, %11, %cst_44 {dimension_numbers = #tpu.dot_dimension_numbers<[1], [0], [0], [1], [0, 0, 1, 1], [], []>, precision = #tpu.contract_precision<fp32>} : vector<2x128xf32>, vector<128x8xf32>, vector<2x8xf32> -> vector<2x8xf32>
    %112 = vector.extract_strided_slice %111 {offsets = [0, 0], sizes = [1, 8], strides = [1, 1]} : vector<2x8xf32> to vector<1x8xf32>
    %cst_45 = arith.constant 5.120000e+02 : f32
    %113 = vector.broadcast %cst_45 : f32 to vector<1x8xf32>
    %114 = arith.divf %112, %113 : vector<1x8xf32>
    %115 = vector.extract_strided_slice %111 {offsets = [1, 0], sizes = [1, 8], strides = [1, 1]} : vector<2x8xf32> to vector<1x8xf32>
    %cst_46 = arith.constant 5.120000e+02 : f32
    %116 = vector.broadcast %cst_46 : f32 to vector<1x8xf32>
    %117 = arith.divf %115, %116 : vector<1x8xf32>
    %118 = arith.mulf %114, %114 : vector<1x8xf32>
    %119 = arith.subf %117, %118 : vector<1x8xf32>
    %cst_47 = arith.constant 0.000000e+00 : f32
    %120 = vector.broadcast %cst_47 : f32 to vector<1x8xf32>
    %121 = arith.maximumf %119, %120 : vector<1x8xf32>
    %cst_48 = arith.constant 9.99999974E-6 : f32
    %122 = vector.broadcast %cst_48 : f32 to vector<1x8xf32>
    %123 = arith.addf %121, %122 : vector<1x8xf32>
    %124 = math.rsqrt %123 : vector<1x8xf32>
    %125 = arith.mulf %7, %124 : vector<1x8xf32>
    %126 = arith.mulf %114, %125 : vector<1x8xf32>
    %127 = arith.subf %8, %126 : vector<1x8xf32>
    %128 = tpu.concatenate %125, %127 in 0 : vector<1x8xf32>, vector<1x8xf32> -> vector<2x8xf32>
    %cst_49 = arith.constant dense<0.000000e+00> : vector<2x128xf32>
    %129 = tpu.matmul %128, %12, %cst_49 {dimension_numbers = #tpu.dot_dimension_numbers<[1], [0], [0], [1], [0, 0, 1, 1], [], []>, precision = #tpu.contract_precision<fp32>} : vector<2x8xf32>, vector<8x128xf32>, vector<2x128xf32> -> vector<2x128xf32>
    %130 = vector.extract_strided_slice %129 {offsets = [0, 0], sizes = [1, 128], strides = [1, 1]} : vector<2x128xf32> to vector<1x128xf32>
    %131 = vector.broadcast %130 : vector<1x128xf32> to vector<32x128xf32>
    %132 = arith.mulf %104, %131 : vector<32x128xf32>
    %133 = vector.extract_strided_slice %129 {offsets = [1, 0], sizes = [1, 128], strides = [1, 1]} : vector<2x128xf32> to vector<1x128xf32>
    %134 = vector.broadcast %133 : vector<1x128xf32> to vector<32x128xf32>
    %135 = arith.addf %132, %134 : vector<32x128xf32>
    %cst_50 = arith.constant 0.000000e+00 : f32
    %136 = vector.broadcast %cst_50 : f32 to vector<32x128xf32>
    %137 = arith.maximumf %135, %136 : vector<32x128xf32>
    %c0_51 = arith.constant 0 : index
    %c0_52 = arith.constant 0 : index
    %138 = vector.load %arg9[%c0_51, %c0_52] : memref<32x128xf32, #tpu.memory_space<vmem>>, vector<32x128xf32>
    tpu.vector_store %arg9[%c0_51, %c0_52], %137 {strides = array<i32>} : memref<32x128xf32, #tpu.memory_space<vmem>>, vector<32x128xf32>,
    return
  }
}

</mosaic_0001>

<bundles_post_ra>
// kernel: double_conv_pallas.1
= control target key start
LH: loop header
LB: loop body
LE: loop exit
PB: predicated region body
PF: predicated region fallthrough
CT: control target
= control target key end

     0   :  { %v6648_v0 = vmov 0.0   ;;  %vm5235_vm0 = vmmov 0   ;;  %vm68_vm1 = vcmask 523264   ;;  %vm99_vm2 = vcmask 1040384   ;;  %s6602_s5 = inlined_call_operand.vmem [shape: f32[64,4], index: 5, kind: input, shape index: {}]   ;;  %s6603_s0 = inlined_call_operand.vmem [shape: f32[32,64], index: 0, kind: input, shape index: {}]   ;;  %s6604_s6 = inlined_call_operand.vmem [shape: f32[4,64], index: 6, kind: input, shape index: {}]   ;;  %s6605_s4 = inlined_call_operand.vmem [shape: f32[32,2], index: 4, kind: input, shape index: {}]   ;;  %s6606_s3 = inlined_call_operand.vmem [shape: f32[6,8], index: 3, kind: input, shape index: {}]   ;;  %s6607_s1 = inlined_call_operand.vmem [shape: bf16[192,128], index: 1, kind: input, shape index: {}]   ;;  %s6608_s7 = inlined_call_operand.vmem [shape: f32[128,8], index: 7, kind: input, shape index: {}]   ;;  %s6609_s8 = inlined_call_operand.vmem [shape: f32[8,128], index: 8, kind: input, shape index: {}]   ;;  %s6610_s2 = inlined_call_operand.vmem [shape: bf16[384,128], index: 2, kind: input, shape index: {}]   ;;  %s6611_s9 = inlined_call_operand.vmem [shape: f32[32,128], index: 9, kind: output, shape index: {}]  }
   0x1   :  { %4503 = vmatprep.subr.mxu0 %v6648_v0  ;;  %4522 = vmatprep.subr.mxu1 %v6648_v0  ;;  %v45_v1 = vld [vmem:[%s6602_s5 + $0x38] sm:$0xff]  ;;  %v44_v2 = vld [vmem:[%s6602_s5 + $0x30] sm:$0xff]  ;;  %v43_v3 = vld [vmem:[%s6602_s5 + $0x28] sm:$0xff]  ;;  %vm665_vm3 = vcmask 1043456   ;;  %vm661_vm4 = vcmask 31744   ;;  %vm2155_vm7 = vcmask 64512  }
   0x2   :  { %v5299_v4 = vand.u32 4294901760, %v45_v1  ;;  %v5301_v5 = vand.u32 4294901760, %v44_v2  ;;  %v5303_v6 = vand.u32 4294901760, %v43_v3  ;;  %v42_v7 = vld [vmem:[%s6602_s5 + $0x20] sm:$0xff]  ;;  %v41_v8 = vld [vmem:[%s6602_s5 + $0x18] sm:$0xff]  ;;  %v40_v9 = vld [vmem:[%s6602_s5 + $0x10] sm:$0xff]  ;;  %4519 = vmatprep.mubr.msk.f32.mxu0 %vm5235_vm0, %v6648_v0  ;;  %4538 = vmatprep.mubr.msk.f32.mxu1 %vm5235_vm0, %v6648_v0 }
   0x3   :  { %v5318_v10 = vand.u32 4294901760, %v42_v7  ;;  %v5320_v11 = vand.u32 4294901760, %v41_v8  ;;  %v5322_v12 = vand.u32 4294901760, %v40_v9  ;;  %v39_v13 = vld [vmem:[%s6602_s5 + $0x8] sm:$0xff]  ;;  %v38_v14 = vld [vmem:[%s6602_s5] sm:$0xff]  ;;  %v5404_v42 = vld [vmem:[%s6603_s0 + $0x10] sm:$0xff] }
   0x4   :  { %4504 = vmatpush3.msra.mxu0 %v5299_v4  ;;  %v5332_v15 = vsub.f32 %v45_v1, %v5299_v4  ;;  %v5335_v16 = vsub.f32 %v44_v2, %v5301_v5  ;;  %v5338_v17 = vsub.f32 %v43_v3, %v5303_v6  ;;  %v5340_v18 = vand.u32 4294901760, %v39_v13  ;;  %v5386_v37 = vld [vmem:[%s6603_s0] sm:$0xff]  ;;  %v5399_v41 = vld [vmem:[%s6603_s0 + $0x8] sm:$0xff]  ;;  %v5409_v43 = vld [vmem:[%s6603_s0 + $0x18] sm:$0xff] }
   0x5   :  { %4505 = vmatprep.subr.mxu0 %v6648_v0  ;;  %v5344_v19 = vsub.f32 %v42_v7, %v5318_v10  ;;  %v5347_v20 = vsub.f32 %v41_v8, %v5320_v11  ;;  %v5350_v21 = vsub.f32 %v40_v9, %v5322_v12  ;;  %v5352_v22 = vand.u32 4294901760, %v38_v14 }
   0x6   :  { %v206_v23 = vand.u32 4294901760, %v5332_v15  ;;  %4506 = vmatpush3.msra.mxu0 %v5301_v5  ;;  %v213_v24 = vand.u32 4294901760, %v5335_v16  ;;  %v220_v25 = vand.u32 4294901760, %v5338_v17  ;;  %v5363_v29 = vsub.f32 %v39_v13, %v5340_v18 }
   0x7   :  { %4507 = vmatprep.subr.mxu0 %v6648_v0  ;;  %v227_v26 = vand.u32 4294901760, %v5344_v19  ;;  %v234_v27 = vand.u32 4294901760, %v5347_v20  ;;  %v241_v28 = vand.u32 4294901760, %v5350_v21  ;;  %v5380_v34 = vsub.f32 %v38_v14, %v5352_v22 }
   0x8   :  { %v207_v30 = vsub.f32 %v5332_v15, %v206_v23  ;;  %v214_v31 = vsub.f32 %v5335_v16, %v213_v24  ;;  %4508 = vmatpush3.msra.mxu0 %v5303_v6  ;;  %v221_v32 = vsub.f32 %v5338_v17, %v220_v25  ;;  %v248_v40 = vand.u32 4294901760, %v5363_v29 }
   0x9   :  { %4509 = vmatprep.subr.mxu0 %v6648_v0  ;;  %v228_v33 = vsub.f32 %v5344_v19, %v227_v26  ;;  %v235_v38 = vsub.f32 %v5347_v20, %v234_v27  ;;  %v242_v39 = vsub.f32 %v5350_v21, %v241_v28  ;;  %v69_v45 = vsel %vm68_vm1, %v5386_v37, 0.0 }
   0xa   :  { %v208_v35 = vand.u32 4294901760, %v207_v30  ;;  %v215_v36 = vand.u32 4294901760, %v214_v31  ;;  %4510 = vmatpush3.msra.mxu0 %v5318_v10  ;;  %v222_v44 = vand.u32 4294901760, %v221_v32  ;;  %v70_v46 = vsel %vm68_vm1, %v5399_v41, 0.0 }
   0xb   :  { %4511 = vmatprep.subr.mxu0 %v6648_v0  ;;  %v72_v47 = vsel %vm68_vm1, %v5404_v42, 0.0  ;;  %v229_v48 = vand.u32 4294901760, %v228_v33  ;;  %v255_v49 = vand.u32 4294901760, %v5380_v34  ;;  %v71_v50 = vadd.f32 %v70_v46, %v69_v45 }
   0xc   :  { %4523 = vmatpush3.msra.mxu1 %v208_v35  ;;  %4512 = vmatpush3.msra.mxu0 %v5320_v11  ;;  %v82_v51 = vmul.f32 %v5386_v37, %v5386_v37  ;;  %v74_v52 = vsel %vm68_vm1, %v5409_v43, 0.0  ;;  %v83_v53 = vmul.f32 %v5399_v41, %v5399_v41  ;;  %v84_v54 = vmul.f32 %v5404_v42, %v5404_v42 }
   0xd   :  { %4524 = vmatprep.subr.mxu1 %v6648_v0  ;;  %4513 = vmatprep.subr.mxu0 %v6648_v0  ;;  %v85_v55 = vmul.f32 %v5409_v43, %v5409_v43  ;;  %v73_v56 = vadd.f32 %v72_v47, %v71_v50  ;;  %v236_v58 = vand.u32 4294901760, %v235_v38  ;;  %v249_v59 = vsub.f32 %v5363_v29, %v248_v40 }
   0xe   :  { %4525 = vmatpush3.msra.mxu1 %v215_v36  ;;  %4514 = vmatpush3.msra.mxu0 %v5322_v12  ;;  %v86_v57 = vsel %vm68_vm1, %v82_v51, 0.0  ;;  %v87_v60 = vsel %vm68_vm1, %v83_v53, 0.0  ;;  %v89_v61 = vsel %vm68_vm1, %v84_v54, 0.0  ;;  %v243_v1 = vand.u32 4294901760, %v242_v39 }
   0xf   :  { %4526 = vmatprep.subr.mxu1 %v6648_v0  ;;  %4515 = vmatprep.subr.mxu0 %v6648_v0  ;;  %v75_v62 = vadd.f32 %v74_v52, %v73_v56  ;;  %v88_v63 = vadd.f32 %v87_v60, %v86_v57  ;;  %v256_v2 = vsub.f32 %v5380_v34, %v255_v49  ;;  %v91_v3 = vsel %vm68_vm1, %v85_v55, 0.0 }
  0x10   :  { %4527 = vmatpush3.msra.mxu1 %v222_v44  ;;  %4516 = vmatpush3.msra.mxu0 %v5340_v18  ;;  %v250_v9 = vand.u32 4294901760, %v249_v59 }
  0x11   :  { %4528 = vmatprep.subr.mxu1 %v6648_v0  ;;  %4517 = vmatprep.subr.mxu0 %v6648_v0  ;;  %v76_v7 = vrot.slane %v75_v62, 4  ;;  %v90_v8 = vadd.f32 %v89_v61, %v88_v63  ;;  %v257_v30 = vand.u32 4294901760, %v256_v2 }
  0x12   :  { %4529 = vmatpush3.msra.mxu1 %v229_v48  ;;  %4518 = vmatpush3.msra.mxu0 %v5352_v22 }
  0x13   :  { %4530 = vmatprep.subr.mxu1 %v6648_v0  ;;  %4541 = vmatprep.subr.mxu0 %v6648_v0  ;;  %v77_v13 = vadd.f32 %v76_v7, %v75_v62  ;;  %v92_v14 = vadd.f32 %v91_v3, %v90_v8  ;;  %v37_v8 = vld [vmem:[%s6606_s3] sm:$0x3f] }
  0x14   :  { %4531 = vmatpush3.msra.mxu1 %v236_v58 }
  0x15   :  { %4532 = vmatprep.subr.mxu1 %v6648_v0  ;;  %v78_v31 = vrot.slane %v77_v13, 2  ;;  %v93_v32 = vrot.slane %v92_v14, 4 }
  0x16   :  { %4533 = vmatpush3.msra.mxu1 %v243_v1 }
  0x17   :  { %4534 = vmatprep.subr.mxu1 %v6648_v0  ;;  %v79_v33 = vadd.f32 %v78_v31, %v77_v13  ;;  %v94_v35 = vadd.f32 %v93_v32, %v92_v14 }
  0x18   :  { %4535 = vmatpush3.msra.mxu1 %v250_v9 }
  0x19   :  { %4536 = vmatprep.subr.mxu1 %v6648_v0  ;;  %v80_v36 = vrot.slane %v79_v33, 1  ;;  %v95_v38 = vrot.slane %v94_v35, 2 }
  0x1a   :  { %4537 = vmatpush3.msra.mxu1 %v257_v30 }
  0x1b   :  { %4560 = vmatprep.subr.mxu1 %v6648_v0  ;;  %v96_v39 = vadd.f32 %v95_v38, %v94_v35  ;;  %v81_v44 = vadd.f32 %v80_v36, %v79_v33 }
  0x1d   :  { %v97_v45 = vrot.slane %v96_v39, 1 }
  0x1f   :  { %v98_v46 = vadd.f32 %v97_v45, %v96_v39  ;;  %v5191_v45 = vld [vmem:[%s6607_s1 + $0x38] sm:$0xff]  }
  0x21   :  { %v100_v47 = vsel %vm99_vm2, %v81_v44, %v98_v46  ;;  %v5192_v46 = vld [vmem:[%s6607_s1 + $0x30] sm:$0xff]  }
  0x22   :  { %v102_v48 = vsel %vm68_vm1, %v100_v47, 0  ;;  %v5193_v47 = vld [vmem:[%s6607_s1 + $0x18] sm:$0xff]  }
  0x23   :  { %v5456_v50 = vand.u32 4294901760, %v102_v48 }
  0x25   :  { %v178_v51 = vsub.f32 %v102_v48, %v5456_v50  ;;  %4539 = vmatmul.mubr.f32.vlgmr.msra.gmra.mxu1 %v5456_v50  ;;  %v5194_v48 = vld [vmem:[%s6607_s1 + $0x28] sm:$0xff]  }
  0x26   :  { %4561 = vmatpush3.msra.mxu1 %v5299_v4  ;;  %4576 = vmatprep.mubr.msk.f32.mxu1 %vm5235_vm0, %v6648_v0 }
  0x27   :  { %v179_v52 = vand.u32 4294901760, %v178_v51  ;;  %4562 = vmatprep.subr.mxu1 %v6648_v0 }
  0x28   :  { %4563 = vmatpush3.msra.mxu1 %v5301_v5 }
  0x29   :  { %v180_v53 = vsub.f32 %v178_v51, %v179_v52  ;;  %4564 = vmatprep.subr.mxu1 %v6648_v0 }
  0x2a   :  { %4565 = vmatpush3.msra.mxu1 %v5303_v6 }
  0x2b   :  { %v181_v54 = vand.u32 4294901760, %v180_v53  ;;  %4566 = vmatprep.subr.mxu1 %v6648_v0  ;;  %v5616_v53 = vld [vmem:[%s6607_s1 + $0x58] sm:$0xff]  }
  0x2c   :  { %4567 = vmatpush3.msra.mxu1 %v5318_v10 }
  0x2d   :  { %4520 = vmatmul.mubr.f32.vlgmr.msra.gmra.mxu0 %v181_v54  ;;  %4568 = vmatprep.subr.mxu1 %v6648_v0  ;;  %v5199_v54 = vld [vmem:[%s6607_s1] sm:$0xff]  }
  0x2e   :  { %4542 = vmatpush3.msra.mxu0 %v5332_v15  ;;  %4569 = vmatpush3.msra.mxu1 %v5320_v11 }
  0x2f   :  { %4543 = vmatprep.subr.mxu0 %v6648_v0  ;;  %4570 = vmatprep.subr.mxu1 %v6648_v0 }
  0x30   :  { %4544 = vmatpush3.msra.mxu0 %v5335_v16  ;;  %4571 = vmatpush3.msra.mxu1 %v5322_v12  ;;  %v5236_v16 = vmov 0  }
  0x31   :  { %4545 = vmatprep.subr.mxu0 %v6648_v0  ;;  %4572 = vmatprep.subr.mxu1 %v6648_v0 }
  0x32   :  { %4546 = vmatpush3.msra.mxu0 %v5338_v17  ;;  %4573 = vmatpush3.msra.mxu1 %v5340_v18  ;;  %v35_v17 = vld [vmem:[%s6605_s4 + $0x10] sm:$0xff] }
  0x33   :  { %4547 = vmatprep.subr.mxu0 %v6648_v0  ;;  %4574 = vmatprep.subr.mxu1 %v6648_v0 }
  0x34   :  { %4548 = vmatpush3.msra.mxu0 %v5344_v19  ;;  %4557 = vmatprep.mubr.msk.f32.mxu0 %vm5235_vm0, %v6648_v0  ;;  %v36_v19 = vld [vmem:[%s6605_s4 + $0x18] sm:$0xff] }
  0x35   :  { %4549 = vmatprep.subr.mxu0 %v6648_v0  ;;  %4575 = vmatpush3.msra.mxu1 %v5352_v22 }
  0x36   :  { %4550 = vmatpush3.msra.mxu0 %v5347_v20  ;;  %4598 = vmatprep.subr.mxu1 %v6648_v0  ;;  %v34_v20 = vld [vmem:[%s6605_s4 + $0x8] sm:$0xff] }
  0x37   :  { %4551 = vmatprep.subr.mxu0 %v6648_v0  ;;  %4577 = vmatmul.mubr.f32.vlgmr.msra.gmra.mxu1 %v179_v52  ;;  %v5197_v52 = vld [vmem:[%s6607_s1 + $0x8] sm:$0xff]  }
  0x38   :  { %4552 = vmatpush3.msra.mxu0 %v5350_v21  ;;  %4599 = vmatpush3.msra.mxu1 %v5299_v4  ;;  %v46_v4 = vld [vmem:[%s6604_s6] sm:$0xf]  ;;  %v5237_v21 = vmov 1  }
  0x39   :  { %4553 = vmatprep.subr.mxu0 %v6648_v0  ;;  %4600 = vmatprep.subr.mxu1 %v6648_v0 }
  0x3a   :  { %4554 = vmatpush3.msra.mxu0 %v5363_v29  ;;  %4601 = vmatpush3.msra.mxu1 %v5301_v5  ;;  %v667_v5 = vsel %vm665_vm3, %v46_v4, 0 }
  0x3b   :  { %4555 = vmatprep.subr.mxu0 %v6648_v0  ;;  %4602 = vmatprep.subr.mxu1 %v6648_v0 }
  0x3c   :  { %4556 = vmatpush3.msra.mxu0 %v5380_v34  ;;  %4603 = vmatpush3.msra.mxu1 %v5303_v6  ;;  %v5549_v6 = vand.u32 4294901760, %v667_v5 }
  0x3d   :  { %4558 = vmatmul.mubr.f32.vlgmr.msra.gmra.mxu0 %v178_v51  ;;  %4579 = vmatprep.subr.mxu0 %v6648_v0  ;;  %v5196_v51 = vld [vmem:[%s6607_s1 + $0x20] sm:$0xff]  }
  0x3e   :  { %4580 = vmatpush3.msra.mxu0 %v206_v23  ;;  %4604 = vmatprep.subr.mxu1 %v6648_v0 }
  0x3f   :  { %4581 = vmatprep.subr.mxu0 %v6648_v0  ;;  %4605 = vmatpush3.msra.mxu1 %v5318_v10  ;;  %v5552_v10 = vsub.f32 %v667_v5, %v5549_v6 }
  0x40   :  { %4582 = vmatpush3.msra.mxu0 %v213_v24  ;;  %4606 = vmatprep.subr.mxu1 %v6648_v0 }
  0x41   :  { %4583 = vmatprep.subr.mxu0 %v6648_v0  ;;  %4607 = vmatpush3.msra.mxu1 %v5320_v11  ;;  %v778_v11 = vand.u32 4294901760, %v5552_v10 }
  0x42   :  { %4584 = vmatpush3.msra.mxu0 %v220_v25  ;;  %4608 = vmatprep.subr.mxu1 %v6648_v0 }
  0x43   :  { %4585 = vmatprep.subr.mxu0 %v6648_v0  ;;  %4609 = vmatpush3.msra.mxu1 %v5322_v12  ;;  %v779_v12 = vsub.f32 %v5552_v10, %v778_v11 }
  0x44   :  { %4586 = vmatpush3.msra.mxu0 %v227_v26  ;;  %4610 = vmatprep.subr.mxu1 %v6648_v0 }
  0x45   :  { %4587 = vmatprep.subr.mxu0 %v6648_v0  ;;  %4611 = vmatpush3.msra.mxu1 %v5340_v18  ;;  %v780_v15 = vand.u32 4294901760, %v779_v12  ;;  %v33_v18 = vld [vmem:[%s6605_s4] sm:$0xff] }
  0x46   :  { %4588 = vmatpush3.msra.mxu0 %v234_v27  ;;  %4612 = vmatprep.subr.mxu1 %v6648_v0 }
  0x47   :  { %4589 = vmatprep.subr.mxu0 %v6648_v0  ;;  %4595 = vmatprep.mubr.msk.f32.mxu0 %vm5235_vm0, %v6648_v0 }
  0x48   :  { %4590 = vmatpush3.msra.mxu0 %v241_v28  ;;  %4613 = vmatpush3.msra.mxu1 %v5352_v22 }
  0x49   :  { %4591 = vmatprep.subr.mxu0 %v6648_v0  ;;  %4614 = vmatprep.mubr.msk.f32.mxu1 %vm5235_vm0, %v6648_v0 }
  0x4a   :  { %4592 = vmatpush3.msra.mxu0 %v248_v40  ;;  %4615 = vmatmul.mubr.f32.vlgmr.msra.gmra.mxu1 %v5456_v50 }
  0x4b   :  { %4593 = vmatprep.subr.mxu0 %v6648_v0  ;;  %4622 = vmatprep.subr.mxu1 %v6648_v0 }
  0x4c   :  { %4594 = vmatpush3.msra.mxu0 %v255_v49  ;;  %4624 = vmatprep.mubr.msk.f32.mxu1 %vm5235_vm0, %v6648_v0 }
  0x4d   :  { %4596 = vmatmul.mubr.f32.vlgmr.msra.gmra.mxu0 %v5456_v50  ;;  %4617 = vmatprep.subr.mxu0 %v6648_v0  ;;  %v5195_v50 = vld [vmem:[%s6607_s1 + $0x10] sm:$0xff]  }
  0x4e   :  { %4619 = vmatprep.mubr.msk.f32.mxu0 %vm5235_vm0, %v6648_v0  ;;  %4618 = vmatpush3.msra.mxu0 %v5549_v6 }
  0x4f   :  { %4627 = vmatprep.subr.mxu0 %v6648_v0  ;;  %4623 = vmatpush3.msra.mxu1 %v780_v15  ;;  %v1115_v15 = vlaneseq }
  0x50   :  { %4632 = vmatprep.subr.mxu1 %v6648_v0  ;;  %5188 = vset.pattern.permute.xlu1 %v5236_v16 }
  0x51   :  { %5187 = vset.pattern.permute.xlu0 %v5236_v16  ;;  %1154 = vperm.xlu1 %5188, %v35_v17  }
  0x52   :  { %1144 = vperm.xlu0 %5187, %v33_v18  }
  0x55   :  { %1159 = vperm.xlu1 %5188, %v36_v19  }
  0x56   :  { %1149 = vperm.xlu0 %5187, %v34_v20  }
  0x59   :  { %5190 = vset.pattern.permute.xlu1 %v5237_v21 }
  0x5a   :  { %5189 = vset.pattern.permute.xlu0 %v5237_v21  ;;  %1180 = vperm.xlu1 %5190, %v34_v20   ;;  %v5623_v21 = vshrl.u32 %v1115_v15, 7 }
  0x5b   :  { %1176 = vperm.xlu0 %5189, %v33_v18  }
  0x5c   :  { %6672 = vst [vmem:[#allocation2_spill] sm:$0xff] %v5623_v21  ;;  %vm1137_vm5 = vcmp.lt.s32.totalorder %v5623_v21, 1  ;;  %vm1170_vm6 = vcmp.lt.s32.totalorder %v5623_v21, 7 }
  0x5e   :  { %1184 = vperm.xlu1 %5190, %v35_v17  }
  0x5f   :  { %1188 = vperm.xlu0 %5189, %v36_v19  }
  0xe5   :  { %v294_v22 = vpop.f32.mrf.mxu1 }
  0xe7   :  { %v4540_v23 = vpop.f32.mrf.mxu1 }
  0xed   :  { %v183_v24 = vpop.f32.mrf.mxu0 }
  0xee   :  { %v295_v34 = vadd.f32 %v294_v22, %v183_v24 }
  0xef   :  { %v4521_v25 = vpop.f32.mrf.mxu0 }
  0xf7   :  { %v463_v26 = vpop.f32.mrf.mxu1 }
  0xf9   :  { %v4578_v27 = vpop.f32.mrf.mxu1 }
  0xfa   :  { %v5629_v27 = vsub.s32 1, %v5623_v21 }
  0xfc   :  { %6674 = vst [vmem:[#allocation4_spill] sm:$0xff] %v5629_v27 }
  0xfd   :  { %v382_v28 = vpop.f32.mrf.mxu0 }
  0xfe   :  { %v383_v40 = vadd.f32 %v382_v28, %v295_v34  ;;  %v5631_v34 = vpop.permute.xlu1 %1154 }
  0xff   :  { %v4559_v29 = vpop.f32.mrf.mxu0  ;;  %6675 = vst [vmem:[#allocation5_spill] sm:$0xff] %v5631_v34 }
 0x100   :  { %v464_v55 = vadd.f32 %v463_v26, %v383_v40  ;;  %v5626_v26 = vsub.s32 0, %v5623_v21  ;;  %v5633_v40 = vpop.permute.xlu0 %1144 }
 0x101   :  { %6676 = vst [vmem:[#allocation6_spill] sm:$0xff] %v5633_v40 }
 0x102   :  { %6673 = vst [vmem:[#allocation3_spill] sm:$0xff] %v5626_v26 }
 0x10a   :  { %v637_v49 = vpop.f32.mrf.mxu1 }
 0x10c   :  { %v4616_v56 = vpop.f32.mrf.mxu1 }
 0x10d   :  { %v558_v57 = vpop.f32.mrf.mxu0 }
 0x10e   :  { %v559_v58 = vadd.f32 %v558_v57, %v464_v55 }
 0x10f   :  { %v4597_v59 = vpop.f32.mrf.mxu0 }
 0x110   :  { %v638_v60 = vadd.f32 %v637_v49, %v559_v58 }
 0x112   :  { %v642_v61 = vmul.f32 0.001953125, %v638_v60 }
 0x114   :  { %v643_v62 = vmul.f32 %v642_v61, %v642_v61 }
 0x116   :  { %v645_v63 = vrot.slane %v643_v62, 7 }
 0x118   :  { %v647_v1 = vsub.f32 %v642_v61, %v645_v63 }
 0x11a   :  { %v648_v2 = vmax.f32 %v647_v1, 0.0  ;;  %v5641_v1 = vpop.permute.xlu1 %1159 }
 0x11b   :  { %6677 = vst [vmem:[#allocation7_spill] sm:$0xff] %v5641_v1 }
 0x11c   :  { %v649_v3 = vadd.f32 1e-05, %v648_v2  ;;  %v5643_v2 = vpop.permute.xlu0 %1149 }
 0x11d   :  { %6678 = vst [vmem:[#allocation8_spill] sm:$0xff] %v5643_v2 }
 0x11e   :  { %5227 = vrsqrt.f32 %v649_v3 }
 0x12b   :  { %v5228_v7 = vpop.eup %5227 }
 0x12c   :  { %v652_v9 = vrot.slane %v5228_v7, 1 }
 0x12e   :  { %v654_v13 = vmul.f32 %v652_v9, %v37_v8 }
 0x130   :  { %v655_v14 = vmul.f32 %v654_v13, %v642_v61 }
 0x132   :  { %v657_v30 = vrot.slane %v655_v14, 7 }
 0x134   :  { %v659_v31 = vsub.f32 %v37_v8, %v657_v30 }
 0x136   :  { %v660_v32 = vsel %vm99_vm2, %v654_v13, %v659_v31 }
 0x137   :  { %v663_v33 = vsel %vm661_vm4, %v660_v32, 0 }
 0x138   :  { %v735_v35 = vand.u32 4294901760, %v663_v33 }
 0x13a   :  { %v736_v36 = vsub.f32 %v663_v33, %v735_v35  ;;  %4625 = vmatmul.mubr.f32.vlgmr.msra.gmra.mxu1 %v735_v35 }
 0x13b   :  { %4633 = vmatpush3.msra.mxu1 %v5549_v6  ;;  %4634 = vmatprep.mubr.msk.f32.mxu1 %vm5235_vm0, %v6648_v0 }
 0x13c   :  { %v737_v38 = vand.u32 4294901760, %v736_v36  ;;  %4642 = vmatprep.subr.mxu1 %v6648_v0 }
 0x13e   :  { %4635 = vmatmul.mubr.f32.vlgmr.msra.gmra.mxu1 %v737_v38  ;;  %v738_v39 = vsub.f32 %v736_v36, %v737_v38 }
 0x13f   :  { %4643 = vmatpush3.msra.mxu1 %v5549_v6  ;;  %4644 = vmatprep.mubr.msk.f32.mxu1 %vm5235_vm0, %v6648_v0 }
 0x140   :  { %v739_v44 = vand.u32 4294901760, %v738_v39  ;;  %4659 = vmatprep.subr.bf16.mxu1 %v5193_v47  ;;  %v5663_v39 = vpop.permute.xlu0 %1176 }
 0x141   :  { %6680 = vst [vmem:[#allocation10_spill] sm:$0xff] %v5663_v39 }
 0x142   :  { %4620 = vmatmul.mubr.f32.vlgmr.msra.gmra.mxu0 %v739_v44  ;;  %4645 = vmatmul.mubr.f32.vlgmr.msra.gmra.mxu1 %v735_v35 }
 0x143   :  { %4628 = vmatpush3.msra.mxu0 %v5552_v10  ;;  %4629 = vmatprep.mubr.msk.f32.mxu0 %vm5235_vm0, %v6648_v0 }
 0x144   :  { %4637 = vmatprep.subr.mxu0 %v6648_v0  ;;  %4660 = vmatpush3.bf16.msra.mxu1 %v5193_v47 }
 0x145   :  { %4661 = vmatprep.subr.bf16.mxu1 %v5195_v50 }
 0x146   :  { %4630 = vmatmul.mubr.f32.vlgmr.msra.gmra.mxu0 %v736_v36  ;;  %v5659_v36 = vpop.permute.xlu1 %1180 }
 0x147   :  { %4638 = vmatpush3.msra.mxu0 %v778_v11  ;;  %4639 = vmatprep.mubr.msk.f32.mxu0 %vm5235_vm0, %v6648_v0  ;;  %6679 = vst [vmem:[#allocation9_spill] sm:$0xff] %v5659_v36 }
 0x148   :  { %4647 = vmatprep.subr.bf16.mxu0 %v5191_v45  ;;  %4662 = vmatpush3.bf16.msra.mxu1 %v5195_v50 }
 0x149   :  { %4663 = vmatprep.subr.bf16.mxu1 %v5197_v52 }
 0x14a   :  { %4640 = vmatmul.mubr.f32.vlgmr.msra.gmra.mxu0 %v735_v35 }
 0x14b   :  { %4648 = vmatpush3.bf16.msra.mxu0 %v5191_v45 }
 0x14c   :  { %4649 = vmatprep.subr.bf16.mxu0 %v5192_v46  ;;  %4664 = vmatpush3.bf16.msra.mxu1 %v5197_v52 }
 0x14d   :  { %4665 = vmatprep.subr.bf16.mxu1 %v5199_v54 }
 0x14f   :  { %4650 = vmatpush3.bf16.msra.mxu0 %v5192_v46 }
 0x150   :  { %4651 = vmatprep.subr.bf16.mxu0 %v5194_v48  ;;  %4666 = vmatpush3.bf16.msra.mxu1 %v5199_v54  ;;  %v5200_v54 = vld [vmem:[%s6607_s1 + $0x50] sm:$0xff]  }
 0x151   :  { %4683 = vmatprep.subr.mxu1 %v6648_v0 }
 0x153   :  { %4652 = vmatpush3.bf16.msra.mxu0 %v5194_v48 }
 0x154   :  { %4653 = vmatprep.subr.bf16.mxu0 %v5196_v51 }
 0x157   :  { %4654 = vmatpush3.bf16.msra.mxu0 %v5196_v51 }
 0x158   :  { %4671 = vmatprep.subr.bf16.mxu0 %v5616_v53 }
 0x1fa   :  { %v817_v4 = vpop.f32.mrf.mxu1 }
 0x1fc   :  { %v4626_v5 = vpop.f32.mrf.mxu1 }
 0x1fe   :  { %v965_v6 = vpop.f32.mrf.mxu1 }
 0x200   :  { %v4636_v10 = vpop.f32.mrf.mxu1 }
 0x201   :  { %v5686_v10 = vpop.permute.xlu1 %1184 }
 0x202   :  { %v741_v11 = vpop.f32.mrf.mxu0  ;;  %v1111_v12 = vpop.f32.mrf.mxu1  ;;  %6681 = vst [vmem:[#allocation11_spill] sm:$0xff] %v5686_v10 }
 0x203   :  { %v818_v18 = vadd.f32 %v817_v4, %v741_v11  ;;  %v5201_v4 = vld [vmem:[%s6607_s1 + $0x48] sm:$0xff]  }
 0x204   :  { %v4621_v16 = vpop.f32.mrf.mxu0  ;;  %v4646_v17 = vpop.f32.mrf.mxu1 }
 0x206   :  { %v891_v19 = vpop.f32.mrf.mxu0 }
 0x207   :  { %v892_v20 = vadd.f32 %v891_v19, %v818_v18  ;;  %v62_v18 = vld [vmem:[%s6608_s7 + $0x78] sm:$0xff] }
 0x208   :  { %v4631_v22 = vpop.f32.mrf.mxu0  ;;  %v5703_v19 = vand.u32 4294901760, %v62_v18 }
 0x209   :  { %v966_v23 = vadd.f32 %v965_v6, %v892_v20  ;;  %v5202_v6 = vld [vmem:[%s6607_s1 + $0x40] sm:$0xff]   ;;  %v61_v20 = vld [vmem:[%s6608_s7 + $0x70] sm:$0xff] }
 0x20a   :  { %v1039_v24 = vpop.f32.mrf.mxu0  ;;  %v5709_v22 = vsub.f32 %v62_v18, %v5703_v19 }
 0x20b   :  { %v1040_v25 = vadd.f32 %v1039_v24, %v966_v23  ;;  %v5711_v23 = vand.u32 4294901760, %v61_v20  ;;  %v60_v24 = vld [vmem:[%s6608_s7 + $0x68] sm:$0xff] }
 0x20c   :  { %v4641_v28 = vpop.f32.mrf.mxu0 }
 0x20d   :  { %v1112_v29 = vadd.f32 %v1111_v12, %v1040_v25  ;;  %v5719_v25 = vand.u32 4294901760, %v5709_v22  ;;  %v5722_v28 = vsub.f32 %v61_v20, %v5711_v23 }
 0x20f   :  { %v1118_v49 = vrot.slane %v1112_v29, %v5626_v26  ;;  %v1126_v55 = vrot.slane %v1112_v29, %v5629_v27  ;;  %v5724_v29 = vand.u32 4294901760, %v60_v24 }
 0x211   :  { %v1119_v56 = vmul.f32 %v1118_v49, %v5386_v37  ;;  %v1120_v57 = vmul.f32 %v1118_v49, %v5399_v41  ;;  %v1121_v58 = vmul.f32 %v1118_v49, %v5404_v42  ;;  %v1122_v59 = vmul.f32 %v1118_v49, %v5409_v43  ;;  %v59_v49 = vld [vmem:[%s6608_s7 + $0x60] sm:$0xff] }
 0x213   :  { %v1128_v60 = vadd.f32 %v1126_v55, %v1120_v57  ;;  %v1129_v61 = vadd.f32 %v1126_v55, %v1121_v58  ;;  %v1127_v62 = vadd.f32 %v1126_v55, %v1119_v56  ;;  %v1130_v63 = vadd.f32 %v1126_v55, %v1122_v59  ;;  %v58_v59 = vld [vmem:[%s6608_s7 + $0x58] sm:$0xff] }
 0x214   :  { %v1584_v55 = vsub.f32 %v5709_v22, %v5719_v25  ;;  %v5734_v56 = vand.u32 4294901760, %v5722_v28  ;;  %v5737_v57 = vsub.f32 %v60_v24, %v5724_v29  ;;  %v5739_v58 = vand.u32 4294901760, %v59_v49 }
 0x215   :  { %v1132_v3 = vrot.slane %v1128_v60, 7  ;;  %v1133_v7 = vrot.slane %v1129_v61, 7  ;;  %v1131_v8 = vrot.slane %v1127_v62, 7  ;;  %v1134_v37 = vrot.slane %v1130_v63, 7 }
 0x216   :  { %v1167_v41 = vrot.slane %v1128_v60, 1  ;;  %v1168_v42 = vrot.slane %v1129_v61, 1  ;;  %v1166_v9 = vrot.slane %v1127_v62, 1  ;;  %v1205_v50 = vpack.c.bf16 %v1128_v60, %v1127_v62 }
 0x217   :  { %v1139_v43 = vsel %vm1137_vm5, %v1132_v3, %v1133_v7  ;;  %v1141_v13 = vsel %vm1137_vm5, %v1134_v37, %v1131_v8  ;;  %v1138_v14 = vsel %vm1137_vm5, %v1133_v7, %v1134_v37  ;;  %v1140_v30 = vsel %vm1137_vm5, %v1131_v8, %v1132_v3  ;;  %v57_v7 = vld [vmem:[%s6608_s7 + $0x50] sm:$0xff] }
 0x218   :  { %v1164_v31 = vmul.f32 %v5631_v34, %v1139_v43  ;;  %v1162_v32 = vmul.f32 %v5633_v40, %v1141_v13  ;;  %v1165_v33 = vmul.f32 %v5641_v1, %v1138_v14  ;;  %v1163_v35 = vmul.f32 %v5643_v2, %v1140_v30  ;;  %4655 = vmatprep.mubr.msk.bf16.mxu0 %vm68_vm1, %v1205_v50  ;;  %v56_v43 = vld [vmem:[%s6608_s7 + $0x48] sm:$0xff] }
 0x219   :  { %v1172_v38 = vsel %vm1170_vm6, %v1167_v41, %v1168_v42  ;;  %v1173_v44 = vsel %vm1170_vm6, %v1166_v9, %v1167_v41  ;;  %v1206_v51 = vpack.c.bf16 %v1130_v63, %v1129_v61  ;;  %v1169_v5 = vrot.slane %v1130_v63, 1 }
 0x21a   :  { %v1196_v45 = vpack.c.bf16 %v1165_v33, %v1164_v31  ;;  %v1195_v46 = vpack.c.bf16 %v1163_v35, %v1162_v32  ;;  %v1192_v47 = vmul.f32 %v5659_v36, %v1172_v38  ;;  %v1191_v48 = vmul.f32 %v5663_v39, %v1173_v44  ;;  %v55_v33 = vld [vmem:[%s6608_s7 + $0x40] sm:$0xff] }
 0x21b   :  { %4656 = vmatmul.mubr.msk.bf16.vlgmr.msra.gmra.mxu0 %vm68_vm1, %v1206_v51  ;;  %v1171_v11 = vsel %vm1170_vm6, %v1168_v42, %v1169_v5  ;;  %v1174_v12 = vsel %vm1170_vm6, %v1169_v5, %v1166_v9  ;;  %v5746_v60 = vand.u32 4294901760, %v1584_v55  ;;  %v1591_v61 = vsub.f32 %v5722_v28, %v5734_v56  ;;  %v51_v55 = vld [vmem:[%s6608_s7 + $0x20] sm:$0xff] }
 0x21c   :  { %v1373_v52 = vpack.c.bf16 %v1192_v47, %v1191_v48  ;;  %4667 = vmatprep.mubr.msk.bf16.mxu1 %vm68_vm1, %v1195_v46  ;;  %4672 = vmatpush3.bf16.msra.mxu0 %v5616_v53  ;;  %v5690_v53 = vpop.permute.xlu0 %1188  ;;  %v1193_v15 = vmul.f32 %v5686_v10, %v1171_v11  ;;  %v5751_v62 = vand.u32 4294901760, %v5737_v57  ;;  %v5754_v63 = vsub.f32 %v59_v49, %v5739_v58  ;;  %v54_v47 = vld [vmem:[%s6608_s7 + $0x38] sm:$0xff] }
 0x21d   :  { %4668 = vmatmul.mubr.msk.bf16.vlgmr.msra.gmra.mxu1 %vm68_vm1, %v1196_v45  ;;  %4673 = vmatprep.subr.bf16.mxu0 %v5200_v54  ;;  %6682 = vst [vmem:[#allocation12_spill] sm:$0xff] %v5690_v53  ;;  %v1194_v16 = vmul.f32 %v5690_v53, %v1174_v12  ;;  %6683 = vst [vmem:[#allocation13_spill] sm:$0xff] %v5746_v60  ;;  %v5757_v3 = vand.u32 4294901760, %v58_v59  ;;  %v5764_v8 = vand.u32 4294901760, %v1591_v61  ;;  %v5771_v42 = vand.u32 4294901760, %v57_v7 }
 0x21e   :  { %4715 = vmatprep.mubr.msk.f32.mxu1 %vm5235_vm0, %v6648_v0  ;;  %4679 = vmatprep.mubr.msk.bf16.mxu0 %vm68_vm1, %v1373_v52  ;;  %v1598_v37 = vsub.f32 %v5737_v57, %v5751_v62  ;;  %v5769_v41 = vand.u32 4294901760, %v5754_v63  ;;  %v5789_v31 = vand.u32 4294901760, %v56_v43  ;;  %v5809_v45 = vand.u32 4294901760, %v55_v33 }
 0x21f   :  { %v1374_v17 = vpack.c.bf16 %v1194_v16, %v1193_v15  ;;  %4684 = vmatpush3.msra.mxu1 %v5703_v19  ;;  %6684 = vst [vmem:[#allocation14_spill] sm:$0xff] %v5764_v8  ;;  %v5775_v9 = vsub.f32 %v58_v59, %v5757_v3  ;;  %v5787_v30 = vsub.f32 %v57_v7, %v5771_v42  ;;  %v5828_v52 = vand.u32 4294901760, %v54_v47  ;;  %v52_v16 = vld [vmem:[%s6608_s7 + $0x28] sm:$0xff] }
 0x220   :  { %4674 = vmatpush3.bf16.msra.mxu0 %v5200_v54  ;;  %4685 = vmatprep.subr.mxu1 %v6648_v0  ;;  %v5782_v13 = vand.u32 4294901760, %v1598_v37  ;;  %v1605_v14 = vsub.f32 %v5754_v63, %v5769_v41  ;;  %v5807_v44 = vsub.f32 %v56_v43, %v5789_v31  ;;  %v5826_v51 = vsub.f32 %v55_v33, %v5809_v45 }
 0x221   :  { %4675 = vmatprep.subr.bf16.mxu0 %v5201_v4  ;;  %4686 = vmatpush3.msra.mxu1 %v5711_v23  ;;  %v5794_v32 = vand.u32 4294901760, %v5775_v9  ;;  %v5804_v38 = vand.u32 4294901760, %v5787_v30  ;;  %v5846_v12 = vsub.f32 %v54_v47, %v5828_v52  ;;  %v5864_v24 = vand.u32 4294901760, %v52_v16 }
 0x222   :  { %4687 = vmatprep.subr.mxu1 %v6648_v0  ;;  %6685 = vst [vmem:[#allocation15_spill] sm:$0xff] %v5782_v13  ;;  %v5801_v35 = vand.u32 4294901760, %v1605_v14  ;;  %v5823_v50 = vand.u32 4294901760, %v5807_v44  ;;  %v5843_v11 = vand.u32 4294901760, %v5826_v51  ;;  %v5883_v37 = vand.u32 4294901760, %v51_v55  ;;  %v50_v14 = vld [vmem:[%s6608_s7 + $0x18] sm:$0xff] }
 0x223   :  { %4688 = vmatpush3.msra.mxu1 %v5724_v29  ;;  %6686 = vst [vmem:[#allocation16_spill] sm:$0xff] %v5794_v32  ;;  %6688 = vst [vmem:[#allocation18_spill] sm:$0xff] %v5804_v38  ;;  %v1612_v46 = vsub.f32 %v5775_v9, %v5794_v32  ;;  %v1619_v48 = vsub.f32 %v5787_v30, %v5804_v38  ;;  %v5862_v20 = vand.u32 4294901760, %v5846_v12 }
 0x224   :  { %4676 = vmatpush3.bf16.msra.mxu0 %v5201_v4  ;;  %4689 = vmatprep.subr.mxu1 %v6648_v0  ;;  %6687 = vst [vmem:[#allocation17_spill] sm:$0xff] %v5801_v35  ;;  %6689 = vst [vmem:[#allocation19_spill] sm:$0xff] %v5823_v50  ;;  %v53_v4 = vld [vmem:[%s6608_s7 + $0x30] sm:$0xff]  ;;  %v1633_v18 = vsub.f32 %v5826_v51, %v5843_v11  ;;  %v5881_v7 = vsub.f32 %v52_v16, %v5864_v24 }
 0x225   :  { %4677 = vmatprep.subr.bf16.mxu0 %v5202_v6  ;;  %4690 = vmatpush3.msra.mxu1 %v5739_v58  ;;  %v5832_v54 = vand.u32 4294901760, %v1612_v46  ;;  %v5838_v5 = vand.u32 4294901760, %v1619_v48  ;;  %6692 = vst [vmem:[#allocation22_spill] sm:$0xff] %v5843_v11  ;;  %v5850_v15 = vand.u32 4294901760, %v53_v4  ;;  %6694 = vst [vmem:[#allocation24_spill] sm:$0xff] %v5862_v20  ;;  %v1640_v61 = vsub.f32 %v5846_v12, %v5862_v20 }
 0x226   :  { %4691 = vmatprep.subr.mxu1 %v6648_v0  ;;  %v5876_v59 = vand.u32 4294901760, %v1633_v18  ;;  %v5898_v46 = vand.u32 4294901760, %v5881_v7  ;;  %v5901_v47 = vsub.f32 %v51_v55, %v5883_v37  ;;  %v5903_v48 = vand.u32 4294901760, %v50_v14 }
 0x227   :  { %4692 = vmatpush3.msra.mxu1 %v5757_v3  ;;  %6690 = vst [vmem:[#allocation20_spill] sm:$0xff] %v5832_v54  ;;  %6691 = vst [vmem:[#allocation21_spill] sm:$0xff] %v5838_v5  ;;  %v5869_v49 = vsub.f32 %v53_v4, %v5850_v15  ;;  %v5895_v33 = vand.u32 4294901760, %v1640_v61 }
 0x228   :  { %4678 = vmatpush3.bf16.msra.mxu0 %v5202_v6  ;;  %4693 = vmatprep.subr.mxu1 %v6648_v0  ;;  %v1626_v6 = vsub.f32 %v5807_v44, %v5823_v50  ;;  %6695 = vst [vmem:[#allocation25_spill] sm:$0xff] %v5876_v59  ;;  %6698 = vst [vmem:[#allocation28_spill] sm:$0xff] %v5898_v46  ;;  %v1654_v16 = vsub.f32 %v5881_v7, %v5898_v46  ;;  %v5917_v18 = vand.u32 4294901760, %v5901_v47 }
 0x229   :  { %4718 = vmatprep.subr.mxu0 %v6648_v0  ;;  %4694 = vmatpush3.msra.mxu1 %v5771_v42  ;;  %v5888_v43 = vand.u32 4294901760, %v5869_v49  ;;  %6697 = vst [vmem:[#allocation27_spill] sm:$0xff] %v5895_v33  ;;  %v5920_v55 = vsub.f32 %v50_v14, %v5903_v48 }
 0x22a   :  { %4695 = vmatprep.subr.mxu1 %v6648_v0  ;;  %6699 = vst [vmem:[#allocation29_spill] sm:$0xff] %v5917_v18  ;;  %v1661_v14 = vsub.f32 %v5901_v47, %v5917_v18 }
 0x22b   :  { %4680 = vmatmul.mubr.msk.bf16.vlgmr.msra.gmra.mxu0 %vm68_vm1, %v1374_v17  ;;  %4696 = vmatpush3.msra.mxu1 %v5789_v31  ;;  %v5857_v17 = vand.u32 4294901760, %v1626_v6  ;;  %6696 = vst [vmem:[#allocation26_spill] sm:$0xff] %v5888_v43  ;;  %v1647_v4 = vsub.f32 %v5869_v49, %v5888_v43  ;;  %v49_v6 = vld [vmem:[%s6608_s7 + $0x10] sm:$0xff] }
 0x22c   :  { %4750 = vmatprep.mubr.msk.f32.mxu0 %vm5235_vm0, %v6648_v0  ;;  %4719 = vmatpush3.msra.mxu0 %v5746_v60  ;;  %v5922_v61 = vand.u32 4294901760, %v49_v6 }
 0x22d   :  { %4720 = vmatprep.subr.mxu0 %v6648_v0  ;;  %4697 = vmatprep.subr.mxu1 %v6648_v0  ;;  %6693 = vst [vmem:[#allocation23_spill] sm:$0xff] %v5857_v17 }
 0x22e   :  { %4721 = vmatpush3.msra.mxu0 %v5764_v8  ;;  %4698 = vmatpush3.msra.mxu1 %v5809_v45 }
 0x22f   :  { %4722 = vmatprep.subr.mxu0 %v6648_v0  ;;  %4699 = vmatprep.subr.mxu1 %v6648_v0 }
 0x230   :  { %4723 = vmatpush3.msra.mxu0 %v5782_v13  ;;  %4700 = vmatpush3.msra.mxu1 %v5828_v52 }
 0x231   :  { %4724 = vmatprep.subr.mxu0 %v6648_v0  ;;  %4701 = vmatprep.subr.mxu1 %v6648_v0 }
 0x232   :  { %4725 = vmatpush3.msra.mxu0 %v5801_v35  ;;  %4702 = vmatpush3.msra.mxu1 %v5850_v15  ;;  %v5952_v35 = vand.u32 4294901760, %v1661_v14 }
 0x233   :  { %4726 = vmatprep.subr.mxu0 %v6648_v0  ;;  %4703 = vmatprep.subr.mxu1 %v6648_v0 }
 0x234   :  { %4727 = vmatpush3.msra.mxu0 %v5832_v54  ;;  %4704 = vmatpush3.msra.mxu1 %v5864_v24  ;;  %v5938_v54 = vand.u32 4294901760, %v5920_v55  ;;  %6703 = vst [vmem:[#allocation33_spill] sm:$0xff] %v5952_v35 }
 0x235   :  { %4728 = vmatprep.subr.mxu0 %v6648_v0  ;;  %4705 = vmatprep.subr.mxu1 %v6648_v0 }
 0x236   :  { %4729 = vmatpush3.msra.mxu0 %v5838_v5  ;;  %4706 = vmatpush3.msra.mxu1 %v5883_v37  ;;  %v5933_v5 = vand.u32 4294901760, %v1654_v16  ;;  %6702 = vst [vmem:[#allocation32_spill] sm:$0xff] %v5938_v54  ;;  %v47_v16 = vld [vmem:[%s6608_s7] sm:$0xff] }
 0x237   :  { %4730 = vmatprep.subr.mxu0 %v6648_v0  ;;  %4707 = vmatprep.subr.mxu1 %v6648_v0  ;;  %v5959_v8 = vand.u32 4294901760, %v47_v16 }
 0x238   :  { %4731 = vmatpush3.msra.mxu0 %v5857_v17  ;;  %v48_v17 = vld [vmem:[%s6608_s7 + $0x8] sm:$0xff]  ;;  %4708 = vmatpush3.msra.mxu1 %v5903_v48  ;;  %6701 = vst [vmem:[#allocation31_spill] sm:$0xff] %v5933_v5 }
 0x239   :  { %4732 = vmatprep.subr.mxu0 %v6648_v0  ;;  %4709 = vmatprep.subr.mxu1 %v6648_v0  ;;  %v5973_v1 = vsub.f32 %v47_v16, %v5959_v8 }
 0x23a   :  { %4733 = vmatpush3.msra.mxu0 %v5876_v59  ;;  %v5926_v59 = vand.u32 4294901760, %v1647_v4  ;;  %v5945_v4 = vand.u32 4294901760, %v48_v17  ;;  %4710 = vmatpush3.msra.mxu1 %v5922_v61 }
 0x23b   :  { %4734 = vmatprep.subr.mxu0 %v6648_v0  ;;  %4711 = vmatprep.subr.mxu1 %v6648_v0 }
 0x23c   :  { %4735 = vmatpush3.msra.mxu0 %v5895_v33  ;;  %6700 = vst [vmem:[#allocation30_spill] sm:$0xff] %v5926_v59  ;;  %v5941_v33 = vsub.f32 %v49_v6, %v5922_v61  ;;  %v1668_v6 = vsub.f32 %v5920_v55, %v5938_v54  ;;  %4712 = vmatpush3.msra.mxu1 %v5945_v4 }
 0x23d   :  { %4736 = vmatprep.subr.mxu0 %v6648_v0  ;;  %4713 = vmatprep.subr.mxu1 %v6648_v0 }
 0x23e   :  { %4737 = vmatpush3.msra.mxu0 %v5926_v59  ;;  %v5957_v13 = vand.u32 4294901760, %v5941_v33  ;;  %v5964_v59 = vsub.f32 %v48_v17, %v5945_v4  ;;  %v5968_v14 = vand.u32 4294901760, %v1668_v6  ;;  %4714 = vmatpush3.msra.mxu1 %v5959_v8  ;;  %v5985_v6 = vand.u32 4294901760, %v5973_v1 }
 0x23f   :  { %4738 = vmatprep.subr.mxu0 %v6648_v0  ;;  %4753 = vmatprep.subr.mxu1 %v6648_v0 }
 0x240   :  { %6704 = vst [vmem:[#allocation34_spill] sm:$0xff] %v5957_v13  ;;  %4739 = vmatpush3.msra.mxu0 %v5933_v5  ;;  %6705 = vst [vmem:[#allocation35_spill] sm:$0xff] %v5968_v14  ;;  %v1675_v60 = vsub.f32 %v5941_v33, %v5957_v13  ;;  %v5978_v5 = vand.u32 4294901760, %v5964_v59 }
 0x241   :  { %4740 = vmatprep.subr.mxu0 %v6648_v0  ;;  %6708 = vst [vmem:[#allocation38_spill] sm:$0xff] %v5985_v6 }
 0x242   :  { %4741 = vmatpush3.msra.mxu0 %v5952_v35  ;;  %6706 = vst [vmem:[#allocation36_spill] sm:$0xff] %v5978_v5  ;;  %v5982_v17 = vand.u32 4294901760, %v1675_v60  ;;  %v1682_v16 = vsub.f32 %v5964_v59, %v5978_v5  ;;  %v1689_v35 = vsub.f32 %v5973_v1, %v5985_v6 }
 0x243   :  { %4742 = vmatprep.subr.mxu0 %v6648_v0 }
 0x244   :  { %6707 = vst [vmem:[#allocation37_spill] sm:$0xff] %v5982_v17  ;;  %4743 = vmatpush3.msra.mxu0 %v5968_v14  ;;  %v5995_v34 = vand.u32 4294901760, %v1682_v16  ;;  %v5998_v60 = vand.u32 4294901760, %v1689_v35 }
 0x245   :  { %4744 = vmatprep.subr.mxu0 %v6648_v0 }
 0x246   :  { %4745 = vmatpush3.msra.mxu0 %v5982_v17  ;;  %6709 = vst [vmem:[#allocation39_spill] sm:$0xff] %v5995_v34  ;;  %6710 = vst [vmem:[#allocation40_spill] sm:$0xff] %v5998_v60 }
 0x247   :  { %4746 = vmatprep.subr.mxu0 %v6648_v0 }
 0x248   :  { %4747 = vmatpush3.msra.mxu0 %v5995_v34 }
 0x249   :  { %4748 = vmatprep.subr.mxu0 %v6648_v0 }
 0x24a   :  { %4749 = vmatpush3.msra.mxu0 %v5998_v60 }
 0x24b   :  { %4788 = vmatprep.subr.mxu0 %v6648_v0 }
 0x2db   :  { %v4657_v14 = vpop.f32.mrf.mxu0 }
 0x2dd   :  { %v1279_v53 = vpop.f32.mrf.mxu0  ;;  %v4669_v10 = vpop.f32.mrf.mxu1 }
 0x2de   :  { %v1367_v26 = vadd.f32 %v4669_v10, %v4657_v14 }
 0x2df   :  { %v4658_v36 = vpop.f32.mrf.mxu0  ;;  %v1358_v39 = vpop.f32.mrf.mxu1 }
 0x2e0   :  { %v1359_v35 = vadd.f32 %v1358_v39, %v1279_v53 }
 0x2e1   :  { %v1282_v17 = vpop.f32.mrf.mxu0  ;;  %v4670_v16 = vpop.f32.mrf.mxu1 }
 0x2e2   :  { %v1370_v60 = vadd.f32 %v4670_v16, %v4658_v36 }
 0x2e3   :  { %v1361_v40 = vpop.f32.mrf.mxu1 }
 0x2e4   :  { %v1362_v34 = vadd.f32 %v1361_v40, %v1282_v17 }
 0x2eb   :  { %v4681_v2 = vpop.f32.mrf.mxu0 }
 0x2ec   :  { %v6006_v13 = vadd.f32 %v4681_v2, %v1367_v26 }
 0x2ed   :  { %v1447_v21 = vpop.f32.mrf.mxu0 }
 0x2ee   :  { %v6004_v6 = vadd.f32 %v1447_v21, %v1359_v35  ;;  %v1477_v21 = vmul.f32 %v6006_v13, %v6006_v13 }
 0x2ef   :  { %v4682_v27 = vpop.f32.mrf.mxu0 }
 0x2f0   :  { %6711 = vst [vmem:[#allocation41_spill] sm:$0xff] %v6004_v6  ;;  %v1475_v54 = vmul.f32 %v6004_v6, %v6004_v6  ;;  %v6012_v18 = vadd.f32 %v4682_v27, %v1370_v60 }
 0x2f1   :  { %v1450_v5 = vpop.f32.mrf.mxu0 }
 0x2f2   :  { %v6008_v0 = vadd.f32 %v1450_v5, %v1362_v34  ;;  %v1478_v34 = vmul.f32 %v6012_v18, %v6012_v18 }
 0x2f4   :  { %6712 = vst [vmem:[#allocation42_spill] sm:$0xff] %v6008_v0  ;;  %v1466_v46 = vadd.f32 %v6008_v0, %v6004_v6  ;;  %v1476_v39 = vmul.f32 %v6008_v0, %v6008_v0 }
 0x2f6   :  { %v1467_v40 = vadd.f32 %v1466_v46, %v6006_v13  ;;  %v1479_v26 = vadd.f32 %v1476_v39, %v1475_v54 }
 0x2f8   :  { %v1468_v2 = vadd.f32 %v1467_v40, %v6012_v18  ;;  %v1480_v36 = vadd.f32 %v1479_v26, %v1477_v21  ;;  %v6713_v21 = vmov 0.0  }
 0x2fa   :  { %v1469_v27 = vrot.slane %v1468_v2, 4  ;;  %v1481_v10 = vadd.f32 %v1480_v36, %v1478_v34  ;;  %v6715_v34 = vld [vmem:[#allocation28_spill] sm:$0xff] }
 0x2fb   :  { %v6717_v36 = vld [vmem:[#allocation32_spill] sm:$0xff] }
 0x2fc   :  { %v1470_v53 = vadd.f32 %v1469_v27, %v1468_v2  ;;  %v1482_v5 = vrot.slane %v1481_v10, 4  ;;  %v6716_v2 = vld [vmem:[#allocation29_spill] sm:$0xff]  ;;  %v6718_v27 = vld [vmem:[#allocation34_spill] sm:$0xff] }
 0x2fe   :  { %v1471_v14 = vrot.slane %v1470_v53, 2  ;;  %v1483_v17 = vadd.f32 %v1482_v5, %v1481_v10  ;;  %v6719_v10 = vld [vmem:[#allocation36_spill] sm:$0xff]  ;;  %v63_v5 = vld [vmem:[%s6609_s8] sm:$0xff] }
 0x300   :  { %v1472_v60 = vadd.f32 %v1471_v14, %v1470_v53  ;;  %v1484_v16 = vrot.slane %v1483_v17, 2  ;;  %v6720_v53 = vld [vmem:[#allocation38_spill] sm:$0xff]  ;;  %v6179_v14 = vand.u32 4294901760, %v63_v5 }
 0x302   :  { %v1473_v35 = vrot.slane %v1472_v60, 1  ;;  %v1485_v0 = vadd.f32 %v1484_v16, %v1483_v17  ;;  %6721 = vst [vmem:[#allocation43_spill] sm:$0xff] %v6179_v14  ;;  %v6182_v17 = vsub.f32 %v63_v5, %v6179_v14 }
 0x304   :  { %v1486_v6 = vrot.slane %v1485_v0, 1  ;;  %v1474_v43 = vadd.f32 %v1473_v35, %v1472_v60  ;;  %6722 = vst [vmem:[#allocation44_spill] sm:$0xff] %v6182_v17  ;;  %v6187_v60 = vand.u32 4294901760, %v6182_v17 }
 0x306   :  { %v1487_v46 = vadd.f32 %v1486_v6, %v1485_v0  ;;  %v6714_v6 = vld [vmem:[#allocation26_spill] sm:$0xff]  ;;  %6723 = vst [vmem:[#allocation45_spill] sm:$0xff] %v6187_v60 }
 0x308   :  { %v1488_v54 = vsel %vm99_vm2, %v1474_v43, %v1487_v46 }
 0x309   :  { %v6025_v39 = vand.u32 4294901760, %v1488_v54 }
 0x30b   :  { %v6028_v40 = vsub.f32 %v1488_v54, %v6025_v39  ;;  %4751 = vmatmul.mubr.f32.vlgmr.msra.gmra.mxu0 %v6025_v39 }
 0x30c   :  { %4789 = vmatpush3.msra.mxu0 %v5703_v19  ;;  %4820 = vmatprep.mubr.msk.f32.mxu0 %vm5235_vm0, %v6713_v21 }
 0x30d   :  { %4790 = vmatprep.subr.mxu0 %v6713_v21  ;;  %v1572_v26 = vand.u32 4294901760, %v6028_v40 }
 0x30e   :  { %4791 = vmatpush3.msra.mxu0 %v5711_v23 }
 0x30f   :  { %4792 = vmatprep.subr.mxu0 %v6713_v21  ;;  %v1573_v0 = vsub.f32 %v6028_v40, %v1572_v26 }
 0x310   :  { %4793 = vmatpush3.msra.mxu0 %v5724_v29 }
 0x311   :  { %4794 = vmatprep.subr.mxu0 %v6713_v21  ;;  %v1574_v43 = vand.u32 4294901760, %v1573_v0 }
 0x312   :  { %4795 = vmatpush3.msra.mxu0 %v5739_v58 }
 0x313   :  { %4796 = vmatprep.subr.mxu0 %v6713_v21  ;;  %4716 = vmatmul.mubr.f32.vlgmr.msra.gmra.mxu1 %v1574_v43 }
 0x314   :  { %4754 = vmatpush3.msra.mxu1 %v5709_v22  ;;  %4797 = vmatpush3.msra.mxu0 %v5757_v3 }
 0x315   :  { %4755 = vmatprep.subr.mxu1 %v6713_v21  ;;  %4798 = vmatprep.subr.mxu0 %v6713_v21 }
 0x316   :  { %4756 = vmatpush3.msra.mxu1 %v5722_v28  ;;  %4799 = vmatpush3.msra.mxu0 %v5771_v42 }
 0x317   :  { %4757 = vmatprep.subr.mxu1 %v6713_v21  ;;  %4800 = vmatprep.subr.mxu0 %v6713_v21 }
 0x318   :  { %4758 = vmatpush3.msra.mxu1 %v5737_v57  ;;  %4801 = vmatpush3.msra.mxu0 %v5789_v31 }
 0x319   :  { %4759 = vmatprep.subr.mxu1 %v6713_v21  ;;  %4802 = vmatprep.subr.mxu0 %v6713_v21 }
 0x31a   :  { %4760 = vmatpush3.msra.mxu1 %v5754_v63  ;;  %4803 = vmatpush3.msra.mxu0 %v5809_v45 }
 0x31b   :  { %4761 = vmatprep.subr.mxu1 %v6713_v21  ;;  %4804 = vmatprep.subr.mxu0 %v6713_v21 }
 0x31c   :  { %4762 = vmatpush3.msra.mxu1 %v5775_v9  ;;  %4805 = vmatpush3.msra.mxu0 %v5828_v52 }
 0x31d   :  { %4763 = vmatprep.subr.mxu1 %v6713_v21  ;;  %4806 = vmatprep.subr.mxu0 %v6713_v21 }
 0x31e   :  { %4764 = vmatpush3.msra.mxu1 %v5787_v30  ;;  %4807 = vmatpush3.msra.mxu0 %v5850_v15 }
 0x31f   :  { %4765 = vmatprep.subr.mxu1 %v6713_v21  ;;  %4808 = vmatprep.subr.mxu0 %v6713_v21 }
 0x320   :  { %4766 = vmatpush3.msra.mxu1 %v5807_v44  ;;  %4809 = vmatpush3.msra.mxu0 %v5864_v24 }
 0x321   :  { %4767 = vmatprep.subr.mxu1 %v6713_v21  ;;  %4810 = vmatprep.subr.mxu0 %v6713_v21 }
 0x322   :  { %4768 = vmatpush3.msra.mxu1 %v5826_v51  ;;  %4811 = vmatpush3.msra.mxu0 %v5883_v37 }
 0x323   :  { %4769 = vmatprep.subr.mxu1 %v6713_v21  ;;  %4812 = vmatprep.subr.mxu0 %v6713_v21 }
 0x324   :  { %4770 = vmatpush3.msra.mxu1 %v5846_v12  ;;  %4813 = vmatpush3.msra.mxu0 %v5903_v48 }
 0x325   :  { %4771 = vmatprep.subr.mxu1 %v6713_v21  ;;  %4814 = vmatprep.subr.mxu0 %v6713_v21 }
 0x326   :  { %4772 = vmatpush3.msra.mxu1 %v5869_v49  ;;  %4815 = vmatpush3.msra.mxu0 %v5922_v61 }
 0x327   :  { %4773 = vmatprep.subr.mxu1 %v6713_v21  ;;  %4816 = vmatprep.subr.mxu0 %v6713_v21 }
 0x328   :  { %4774 = vmatpush3.msra.mxu1 %v5881_v7  ;;  %4817 = vmatpush3.msra.mxu0 %v5945_v4 }
 0x329   :  { %4775 = vmatprep.subr.mxu1 %v6713_v21  ;;  %4818 = vmatprep.subr.mxu0 %v6713_v21 }
 0x32a   :  { %4776 = vmatpush3.msra.mxu1 %v5901_v47  ;;  %4819 = vmatpush3.msra.mxu0 %v5959_v8 }
 0x32b   :  { %4777 = vmatprep.subr.mxu1 %v6713_v21  ;;  %4821 = vmatmul.mubr.f32.vlgmr.msra.gmra.mxu0 %v1572_v26 }
 0x32c   :  { %4858 = vmatprep.subr.mxu0 %v6713_v21  ;;  %4778 = vmatpush3.msra.mxu1 %v5920_v55 }
 0x32d   :  { %4859 = vmatpush3.msra.mxu0 %v5703_v19  ;;  %4779 = vmatprep.subr.mxu1 %v6713_v21 }
 0x32e   :  { %4860 = vmatprep.subr.mxu0 %v6713_v21  ;;  %4780 = vmatpush3.msra.mxu1 %v5941_v33 }
 0x32f   :  { %4861 = vmatpush3.msra.mxu0 %v5711_v23  ;;  %4781 = vmatprep.subr.mxu1 %v6713_v21 }
 0x330   :  { %4862 = vmatprep.subr.mxu0 %v6713_v21  ;;  %4782 = vmatpush3.msra.mxu1 %v5964_v59 }
 0x331   :  { %4863 = vmatpush3.msra.mxu0 %v5724_v29  ;;  %4783 = vmatprep.subr.mxu1 %v6713_v21 }
 0x332   :  { %4864 = vmatprep.subr.mxu0 %v6713_v21  ;;  %4784 = vmatpush3.msra.mxu1 %v5973_v1 }
 0x333   :  { %4785 = vmatprep.mubr.msk.f32.mxu1 %vm5235_vm0, %v6713_v21  ;;  %4865 = vmatpush3.msra.mxu0 %v5739_v58 }
 0x334   :  { %4786 = vmatmul.mubr.f32.vlgmr.msra.gmra.mxu1 %v6028_v40  ;;  %4823 = vmatprep.subr.mxu1 %v6713_v21 }
 0x335   :  { %4866 = vmatprep.subr.mxu0 %v6713_v21  ;;  %4824 = vmatpush3.msra.mxu1 %v5719_v25 }
 0x336   :  { %4867 = vmatpush3.msra.mxu0 %v5757_v3  ;;  %4825 = vmatprep.subr.mxu1 %v6713_v21 }
 0x337   :  { %4868 = vmatprep.subr.mxu0 %v6713_v21  ;;  %4826 = vmatpush3.msra.mxu1 %v5734_v56 }
 0x338   :  { %4869 = vmatpush3.msra.mxu0 %v5771_v42  ;;  %4827 = vmatprep.subr.mxu1 %v6713_v21 }
 0x339   :  { %4870 = vmatprep.subr.mxu0 %v6713_v21  ;;  %4828 = vmatpush3.msra.mxu1 %v5751_v62 }
 0x33a   :  { %4871 = vmatpush3.msra.mxu0 %v5789_v31  ;;  %4829 = vmatprep.subr.mxu1 %v6713_v21 }
 0x33b   :  { %4872 = vmatprep.subr.mxu0 %v6713_v21  ;;  %4830 = vmatpush3.msra.mxu1 %v5769_v41 }
 0x33c   :  { %4873 = vmatpush3.msra.mxu0 %v5809_v45  ;;  %4831 = vmatprep.subr.mxu1 %v6713_v21 }
 0x33d   :  { %4874 = vmatprep.subr.mxu0 %v6713_v21  ;;  %4832 = vmatpush3.msra.mxu1 %v5794_v32 }
 0x33e   :  { %4875 = vmatpush3.msra.mxu0 %v5828_v52  ;;  %4833 = vmatprep.subr.mxu1 %v6713_v21 }
 0x33f   :  { %4876 = vmatprep.subr.mxu0 %v6713_v21  ;;  %4834 = vmatpush3.msra.mxu1 %v5804_v38 }
 0x340   :  { %4877 = vmatpush3.msra.mxu0 %v5850_v15  ;;  %4835 = vmatprep.subr.mxu1 %v6713_v21 }
 0x341   :  { %4878 = vmatprep.subr.mxu0 %v6713_v21  ;;  %4836 = vmatpush3.msra.mxu1 %v5823_v50 }
 0x342   :  { %4879 = vmatpush3.msra.mxu0 %v5864_v24  ;;  %4837 = vmatprep.subr.mxu1 %v6713_v21 }
 0x343   :  { %4880 = vmatprep.subr.mxu0 %v6713_v21  ;;  %4838 = vmatpush3.msra.mxu1 %v5843_v11 }
 0x344   :  { %4881 = vmatpush3.msra.mxu0 %v5883_v37  ;;  %4839 = vmatprep.subr.mxu1 %v6713_v21 }
 0x345   :  { %4882 = vmatprep.subr.mxu0 %v6713_v21  ;;  %4840 = vmatpush3.msra.mxu1 %v5862_v20 }
 0x346   :  { %4883 = vmatpush3.msra.mxu0 %v5903_v48  ;;  %4841 = vmatprep.subr.mxu1 %v6713_v21 }
 0x347   :  { %4884 = vmatprep.subr.mxu0 %v6713_v21  ;;  %4842 = vmatpush3.msra.mxu1 %v6714_v6 }
 0x348   :  { %4885 = vmatpush3.msra.mxu0 %v5922_v61  ;;  %4843 = vmatprep.subr.mxu1 %v6713_v21 }
 0x349   :  { %4886 = vmatprep.subr.mxu0 %v6713_v21  ;;  %4844 = vmatpush3.msra.mxu1 %v6715_v34 }
 0x34a   :  { %4887 = vmatpush3.msra.mxu0 %v5945_v4  ;;  %4845 = vmatprep.subr.mxu1 %v6713_v21 }
 0x34b   :  { %4888 = vmatprep.subr.mxu0 %v6713_v21  ;;  %4846 = vmatpush3.msra.mxu1 %v6716_v2 }
 0x34c   :  { %4889 = vmatpush3.msra.mxu0 %v5959_v8  ;;  %4890 = vmatprep.mubr.msk.f32.mxu0 %vm5235_vm0, %v6713_v21 }
 0x34d   :  { %4847 = vmatprep.subr.mxu1 %v6713_v21  ;;  %4891 = vmatmul.mubr.f32.vlgmr.msra.gmra.mxu0 %v6025_v39 }
 0x34e   :  { %4848 = vmatpush3.msra.mxu1 %v6717_v36  ;;  %4855 = vmatprep.mubr.msk.f32.mxu1 %vm5235_vm0, %v6713_v21 }
 0x34f   :  { %4849 = vmatprep.subr.mxu1 %v6713_v21  ;;  %4913 = vmatprep.subr.mxu0 %v6713_v21 }
 0x350   :  { %4850 = vmatpush3.msra.mxu1 %v6718_v27  ;;  %4915 = vmatprep.mubr.msk.f32.mxu0 %vm5235_vm0, %v6713_v21 }
 0x351   :  { %4851 = vmatprep.subr.mxu1 %v6713_v21  ;;  %4914 = vmatpush3.msra.mxu0 %v6187_v60 }
 0x352   :  { %4852 = vmatpush3.msra.mxu1 %v6719_v10 }
 0x353   :  { %4853 = vmatprep.subr.mxu1 %v6713_v21 }
 0x354   :  { %4854 = vmatpush3.msra.mxu1 %v6720_v53 }
 0x355   :  { %4856 = vmatmul.mubr.f32.vlgmr.msra.gmra.mxu1 %v6025_v39  ;;  %4893 = vmatprep.subr.mxu1 %v6713_v21 }
 0x356   :  { %4895 = vmatprep.mubr.msk.f32.mxu1 %vm5235_vm0, %v6713_v21  ;;  %4894 = vmatpush3.msra.mxu1 %v6179_v14 }
 0x357   :  { %4898 = vmatprep.subr.mxu1 %v6713_v21 }
 0x3cb   :  { %v1727_v16 = vpop.f32.mrf.mxu0 }
 0x3cd   :  { %v4752_v35 = vpop.f32.mrf.mxu0 }
 0x3d3   :  { %v1576_v46 = vpop.f32.mrf.mxu1 }
 0x3d4   :  { %v1728_v5 = vadd.f32 %v1727_v16, %v1576_v46  ;;  %v6193_v16 = vld [vmem:[%s6606_s3] sm:$0x3f] }
 0x3d5   :  { %v4717_v54 = vpop.f32.mrf.mxu1  ;;  %6724 = vst [vmem:[#allocation46_spill] sm:$0xff] %v6193_v16 }
 0x3eb   :  { %v1920_v39 = vpop.f32.mrf.mxu0 }
 0x3ed   :  { %v4822_v40 = vpop.f32.mrf.mxu0 }
 0x3f4   :  { %v1831_v26 = vpop.f32.mrf.mxu1 }
 0x3f5   :  { %v1832_v10 = vadd.f32 %v1831_v26, %v1728_v5  ;;  %v5205_v5 = vld [vmem:[%s6610_s2 + $0xb8] sm:$0xff]  }
 0x3f6   :  { %v4787_v0 = vpop.f32.mrf.mxu1 }
 0x3f7   :  { %v1921_v27 = vadd.f32 %v1920_v39, %v1832_v10  ;;  %v5203_v0 = vld [vmem:[%s6610_s2 + $0x78] sm:$0xff]  }
 0x3f8   :  { %4351 = vmatprep.subr.bf16.mxu0 %v5203_v0  ;;  %v5223_v0 = vld [vmem:[%s6610_s2 + $0x88] sm:$0xff]  }
 0x40d   :  { %v2126_v43 = vpop.f32.mrf.mxu0 }
 0x40f   :  { %v4892_v53 = vpop.f32.mrf.mxu0 }
 0x415   :  { %v2039_v36 = vpop.f32.mrf.mxu1 }
 0x416   :  { %v2040_v2 = vadd.f32 %v2039_v36, %v1921_v27  ;;  %v2269_v27 = vsub.f32 %v6182_v17, %v6187_v60 }
 0x417   :  { %v4857_v34 = vpop.f32.mrf.mxu1 }
 0x418   :  { %v2127_v6 = vadd.f32 %v2126_v43, %v2040_v2  ;;  %v6201_v26 = vand.u32 4294901760, %v2269_v27  ;;  %v5204_v43 = vld [vmem:[%s6610_s2 + $0x38] sm:$0xff]   ;;  %v5219_v27 = vld [vmem:[%s6610_s2 + $0x10] sm:$0xff]  }
 0x41a   :  { %v2130_v20 = vmul.f32 0.001953125, %v2127_v6  ;;  %6725 = vst [vmem:[#allocation47_spill] sm:$0xff] %v6201_v26 }
 0x41c   :  { %v2131_v11 = vmul.f32 %v2130_v20, %v2130_v20 }
 0x41e   :  { %v2133_v50 = vrot.slane %v2131_v11, 7 }
 0x420   :  { %v2135_v38 = vsub.f32 %v2130_v20, %v2133_v50 }
 0x422   :  { %v2136_v35 = vmax.f32 %v2135_v38, 0.0 }
 0x424   :  { %v2137_v32 = vadd.f32 1e-05, %v2136_v35  ;;  %v5206_v35 = vld [vmem:[%s6610_s2 + $0x70] sm:$0xff]  }
 0x426   :  { %5229 = vrsqrt.f32 %v2137_v32 }
 0x433   :  { %v5230_v54 = vpop.eup %5229 }
 0x434   :  { %v2140_v40 = vrot.slane %v5230_v54, 7  ;;  %v5207_v54 = vld [vmem:[%s6610_s2 + $0x30] sm:$0xff]  }
 0x436   :  { %v2142_v10 = vmul.f32 %v6193_v16, %v2140_v40  ;;  %v5208_v40 = vld [vmem:[%s6610_s2 + $0xb0] sm:$0xff]  }
 0x438   :  { %v2144_v53 = vrot.slane %v2142_v10, 2  ;;  %v5209_v10 = vld [vmem:[%s6610_s2 + $0x68] sm:$0xff]  }
 0x43a   :  { %v2146_v36 = vmul.f32 %v2144_v53, %v2130_v20 }
 0x43c   :  { %v2148_v34 = vrot.slane %v2146_v36, 5  ;;  %v5211_v36 = vld [vmem:[%s6610_s2 + $0xa8] sm:$0xff]  }
 0x43e   :  { %v2150_v6 = vsub.f32 %v6193_v16, %v2148_v34  ;;  %v5212_v34 = vld [vmem:[%s6610_s2 + $0x60] sm:$0xff]  }
 0x440   :  { %v2152_v2 = vrot.slane %v2150_v6, 2  ;;  %v5213_v6 = vld [vmem:[%s6610_s2 + $0x20] sm:$0xff]  }
 0x442   :  { %v2154_v38 = vsel %vm99_vm2, %v2144_v53, %v2152_v2  ;;  %v5210_v53 = vld [vmem:[%s6610_s2 + $0x28] sm:$0xff]   ;;  %v5214_v2 = vld [vmem:[%s6610_s2 + $0xa0] sm:$0xff]  }
 0x443   :  { %v2157_v32 = vsel %vm2155_vm7, %v2154_v38, 0  ;;  %v5215_v38 = vld [vmem:[%s6610_s2 + $0x58] sm:$0xff]  }
 0x444   :  { %v2225_v50 = vand.u32 4294901760, %v2157_v32 }
 0x446   :  { %v2226_v11 = vsub.f32 %v2157_v32, %v2225_v50  ;;  %4916 = vmatmul.mubr.f32.vlgmr.msra.gmra.mxu0 %v2225_v50  ;;  %v5216_v32 = vld [vmem:[%s6610_s2 + $0x18] sm:$0xff]  }
 0x447   :  { %4352 = vmatpush3.bf16.msra.mxu0 %v5204_v43  ;;  %v5224_v43 = vld [vmem:[%s6610_s2 + $0x40] sm:$0xff]  }
 0x448   :  { %v2227_v46 = vand.u32 4294901760, %v2226_v11  ;;  %4353 = vmatprep.subr.bf16.mxu0 %v5206_v35  ;;  %v5226_v35 = vld [vmem:[%s6610_s2 + $0x80] sm:$0xff]  }
 0x44a   :  { %v2228_v39 = vsub.f32 %v2226_v11, %v2227_v46 }
 0x44b   :  { %4354 = vmatpush3.bf16.msra.mxu0 %v5207_v54 }
 0x44c   :  { %v2229_v20 = vand.u32 4294901760, %v2228_v39  ;;  %4355 = vmatprep.subr.bf16.mxu0 %v5209_v10  ;;  %v5221_v39 = vld [vmem:[%s6610_s2 + $0x48] sm:$0xff]  }
 0x44e   :  { %4896 = vmatmul.mubr.f32.vlgmr.msra.gmra.mxu1 %v2229_v20  ;;  %v5222_v20 = vld [vmem:[%s6610_s2 + $0x8] sm:$0xff]  }
 0x44f   :  { %4899 = vmatpush3.msra.mxu1 %v6201_v26  ;;  %4900 = vmatprep.mubr.msk.f32.mxu1 %vm5235_vm0, %v6713_v21 }
 0x450   :  { %4903 = vmatprep.subr.mxu1 %v6713_v21  ;;  %4356 = vmatpush3.bf16.msra.mxu0 %v5210_v53 }
 0x451   :  { %4357 = vmatprep.subr.bf16.mxu0 %v5212_v34 }
 0x452   :  { %4901 = vmatmul.mubr.f32.vlgmr.msra.gmra.mxu1 %v2225_v50 }
 0x453   :  { %4904 = vmatpush3.msra.mxu1 %v6182_v17  ;;  %4905 = vmatprep.mubr.msk.f32.mxu1 %vm5235_vm0, %v6713_v21 }
 0x454   :  { %4908 = vmatprep.subr.mxu1 %v6713_v21  ;;  %4358 = vmatpush3.bf16.msra.mxu0 %v5213_v6 }
 0x455   :  { %4359 = vmatprep.subr.bf16.mxu0 %v5215_v38 }
 0x456   :  { %4906 = vmatmul.mubr.f32.vlgmr.msra.gmra.mxu1 %v2226_v11  ;;  %v5218_v11 = vld [vmem:[%s6610_s2 + $0x50] sm:$0xff]  }
 0x457   :  { %4909 = vmatpush3.msra.mxu1 %v6179_v14  ;;  %4910 = vmatprep.mubr.msk.f32.mxu1 %vm5235_vm0, %v6713_v21 }
 0x458   :  { %4918 = vmatprep.subr.mxu1 %v6713_v21  ;;  %4360 = vmatpush3.bf16.msra.mxu0 %v5216_v32 }
 0x459   :  { %4361 = vmatprep.subr.bf16.mxu0 %v5218_v11 }
 0x45a   :  { %4911 = vmatmul.mubr.f32.vlgmr.msra.gmra.mxu1 %v2227_v46  ;;  %v5220_v46 = vld [vmem:[%s6610_s2 + $0x90] sm:$0xff]  }
 0x45b   :  { %4919 = vmatpush3.msra.mxu1 %v6179_v14  ;;  %4920 = vmatprep.mubr.msk.f32.mxu1 %vm5235_vm0, %v6713_v21 }
 0x45c   :  { %4923 = vmatprep.subr.bf16.mxu1 %v5205_v5  ;;  %4362 = vmatpush3.bf16.msra.mxu0 %v5219_v27 }
 0x45d   :  { %4363 = vmatprep.subr.bf16.mxu0 %v5221_v39 }
 0x45e   :  { %4921 = vmatmul.mubr.f32.vlgmr.msra.gmra.mxu1 %v2225_v50  ;;  %v5217_v50 = vld [vmem:[%s6610_s2 + $0x98] sm:$0xff]  }
 0x45f   :  { %4924 = vmatpush3.bf16.msra.mxu1 %v5205_v5  ;;  %v5225_v5 = vld [vmem:[%s6610_s2] sm:$0xff]  }
 0x460   :  { %4925 = vmatprep.subr.bf16.mxu1 %v5208_v40  ;;  %4364 = vmatpush3.bf16.msra.mxu0 %v5222_v20 }
 0x461   :  { %4365 = vmatprep.subr.bf16.mxu0 %v5224_v43  ;;  %v6726_v43 = vld [vmem:[#allocation3_spill] sm:$0xff] }
 0x463   :  { %4926 = vmatpush3.bf16.msra.mxu1 %v5208_v40 }
 0x464   :  { %4927 = vmatprep.subr.bf16.mxu1 %v5211_v36  ;;  %4366 = vmatpush3.bf16.msra.mxu0 %v5225_v5 }
 0x465   :  { %4943 = vmatprep.subr.mxu0 %v6713_v21 }
 0x467   :  { %4928 = vmatpush3.bf16.msra.mxu1 %v5211_v36 }
 0x468   :  { %4929 = vmatprep.subr.bf16.mxu1 %v5214_v2 }
 0x46b   :  { %4930 = vmatpush3.bf16.msra.mxu1 %v5214_v2 }
 0x46c   :  { %4931 = vmatprep.subr.bf16.mxu1 %v5217_v50 }
 0x46f   :  { %4932 = vmatpush3.bf16.msra.mxu1 %v5217_v50 }
 0x470   :  { %4933 = vmatprep.subr.bf16.mxu1 %v5220_v46 }
 0x473   :  { %4934 = vmatpush3.bf16.msra.mxu1 %v5220_v46 }
 0x474   :  { %4935 = vmatprep.subr.bf16.mxu1 %v5223_v0 }
 0x477   :  { %4936 = vmatpush3.bf16.msra.mxu1 %v5223_v0 }
 0x478   :  { %4937 = vmatprep.subr.bf16.mxu1 %v5226_v35 }
 0x47b   :  { %4938 = vmatpush3.bf16.msra.mxu1 %v5226_v35  ;;  %v6727_v35 = vld [vmem:[#allocation4_spill] sm:$0xff] }
 0x47c   :  { %4978 = vmatprep.subr.mxu1 %v6713_v21 }
 0x506   :  { %v2529_v54 = vpop.f32.mrf.mxu0 }
 0x508   :  { %v4917_v40 = vpop.f32.mrf.mxu0 }
 0x509   :  { %v6728_v40 = vld [vmem:[#allocation41_spill] sm:$0xff] }
 0x50e   :  { %v2231_v10 = vpop.f32.mrf.mxu1 }
 0x510   :  { %v4897_v53 = vpop.f32.mrf.mxu1 }
 0x511   :  { %v6729_v53 = vld [vmem:[#allocation42_spill] sm:$0xff] }
 0x512   :  { %v2307_v36 = vpop.f32.mrf.mxu1 }
 0x513   :  { %v2308_v2 = vadd.f32 %v2307_v36, %v2231_v10 }
 0x514   :  { %v4902_v34 = vpop.f32.mrf.mxu1 }
 0x516   :  { %v2381_v6 = vpop.f32.mrf.mxu1 }
 0x517   :  { %v2382_v32 = vadd.f32 %v2381_v6, %v2308_v2 }
 0x518   :  { %v4907_v38 = vpop.f32.mrf.mxu1 }
 0x51a   :  { %v2455_v50 = vpop.f32.mrf.mxu1 }
 0x51b   :  { %v2456_v11 = vadd.f32 %v2455_v50, %v2382_v32 }
 0x51c   :  { %v4912_v27 = vpop.f32.mrf.mxu1 }
 0x51d   :  { %v2530_v46 = vadd.f32 %v2529_v54, %v2456_v11 }
 0x51e   :  { %v2601_v39 = vpop.f32.mrf.mxu1 }
 0x51f   :  { %v2602_v20 = vadd.f32 %v2601_v39, %v2530_v46 }
 0x520   :  { %v4922_v0 = vpop.f32.mrf.mxu1 }
 0x521   :  { %v2608_v5 = vrot.slane %v2602_v20, %v6726_v43  ;;  %v2616_v60 = vrot.slane %v2602_v20, %v6727_v35 }
 0x523   :  { %v2609_v17 = vmul.f32 %v2608_v5, %v6728_v40  ;;  %v2610_v16 = vmul.f32 %v2608_v5, %v6729_v53  ;;  %v2611_v34 = vmul.f32 %v2608_v5, %v6006_v13  ;;  %v2612_v10 = vmul.f32 %v2608_v5, %v6012_v18  ;;  %v6746_v53 = vld [vmem:[#allocation25_spill] sm:$0xff] }
 0x525   :  { %v2619_v36 = vadd.f32 %v2616_v60, %v2611_v34  ;;  %v2620_v6 = vadd.f32 %v2616_v60, %v2612_v10  ;;  %v2617_v2 = vadd.f32 %v2616_v60, %v2609_v17  ;;  %v2618_v38 = vadd.f32 %v2616_v60, %v2610_v16  ;;  %v6731_v16 = vld [vmem:[#allocation6_spill] sm:$0xff]  ;;  %v6732_v34 = vld [vmem:[#allocation8_spill] sm:$0xff] }
 0x527   :  { %v2623_v54 = vmax.f32 %v2619_v36, 0.0  ;;  %v2624_v32 = vmax.f32 %v2620_v6, 0.0  ;;  %v2621_v50 = vmax.f32 %v2617_v2, 0.0  ;;  %v2622_v11 = vmax.f32 %v2618_v38, 0.0  ;;  %v6733_v2 = vld [vmem:[#allocation10_spill] sm:$0xff] }
 0x529   :  { %v2625_v27 = vrot.slane %v2621_v50, 7  ;;  %v2626_v46 = vrot.slane %v2622_v11, 7  ;;  %v2650_v39 = vpack.c.bf16 %v2622_v11, %v2621_v50  ;;  %v2628_v20 = vrot.slane %v2624_v32, 7 }
 0x52a   :  { %v2637_v0 = vrot.slane %v2621_v50, 1  ;;  %v2638_v40 = vrot.slane %v2622_v11, 1  ;;  %v2639_v35 = vrot.slane %v2623_v54, 1  ;;  %v2640_v17 = vrot.slane %v2624_v32, 1  ;;  %v6734_v50 = vld [vmem:[#allocation9_spill] sm:$0xff] }
 0x52b   :  { %2879 = vmatprep.mubr.bf16.mxu0 %v2650_v39  ;;  %v2631_v13 = vsel %vm1137_vm5, %v2625_v27, %v2626_v46  ;;  %v2632_v18 = vsel %vm1137_vm5, %v2628_v20, %v2625_v27  ;;  %v2627_v60 = vrot.slane %v2623_v54, 7  ;;  %v2653_v26 = vpack.c.bf16 %v2624_v32, %v2623_v54  ;;  %v6740_v54 = vld [vmem:[#allocation14_spill] sm:$0xff]  ;;  %v6743_v32 = vld [vmem:[#allocation20_spill] sm:$0xff] }
 0x52c   :  { %v2633_v5 = vmul.f32 %v2632_v18, %v6731_v16  ;;  %v2634_v10 = vmul.f32 %v2631_v13, %v6732_v34  ;;  %v2642_v36 = vsel %vm1170_vm6, %v2638_v40, %v2639_v35  ;;  %v2643_v6 = vsel %vm1170_vm6, %v2637_v0, %v2638_v40  ;;  %v6735_v18 = vld [vmem:[#allocation11_spill] sm:$0xff]  ;;  %v6736_v13 = vld [vmem:[#allocation12_spill] sm:$0xff] }
 0x52d   :  { %v2645_v38 = vmul.f32 %v2643_v6, %v6733_v2  ;;  %v2646_v11 = vmul.f32 %v2642_v36, %v6734_v50  ;;  %v2641_v39 = vsel %vm1170_vm6, %v2639_v35, %v2640_v17  ;;  %v2644_v27 = vsel %vm1170_vm6, %v2640_v17, %v2637_v0  ;;  %v6737_v35 = vld [vmem:[#allocation5_spill] sm:$0xff]  ;;  %v6738_v17 = vld [vmem:[#allocation7_spill] sm:$0xff]  ;;  %v6748_v2 = vld [vmem:[#allocation30_spill] sm:$0xff] }
 0x52e   :  { %v2649_v43 = vpack.c.bf16 %v2634_v10, %v2633_v5  ;;  %v2647_v16 = vmul.f32 %v2641_v39, %v6735_v18  ;;  %v2648_v34 = vmul.f32 %v2644_v27, %v6736_v13  ;;  %v2629_v40 = vsel %vm1137_vm5, %v2627_v60, %v2628_v20  ;;  %v6739_v10 = vld [vmem:[#allocation13_spill] sm:$0xff]  ;;  %v6745_v20 = vld [vmem:[#allocation23_spill] sm:$0xff]  ;;  %v6754_v18 = vld [vmem:[#allocation40_spill] sm:$0xff] }
 0x52f   :  { %v2651_v14 = vpack.c.bf16 %v2646_v11, %v2645_v38  ;;  %v2630_v6 = vsel %vm1137_vm5, %v2626_v46, %v2627_v60  ;;  %v2636_v5 = vmul.f32 %v2629_v40, %v6738_v17  ;;  %v6744_v46 = vld [vmem:[#allocation21_spill] sm:$0xff]  ;;  %v6747_v60 = vld [vmem:[#allocation27_spill] sm:$0xff] }
 0x530   :  { %2880 = vmatmul.mubr.bf16.vlgmr.msra.gmra.mxu0 %v2649_v43  ;;  %v2654_v36 = vpack.c.bf16 %v2648_v34, %v2647_v16  ;;  %v2635_v0 = vmul.f32 %v2630_v6, %v6737_v35  ;;  %v6742_v43 = vld [vmem:[#allocation17_spill] sm:$0xff]  ;;  %v6749_v38 = vld [vmem:[#allocation31_spill] sm:$0xff] }
 0x531   :  { %4939 = vmatprep.mubr.bf16.mxu1 %v2651_v14  ;;  %2887 = vmatprep.mubr.bf16.mxu0 %v2653_v26  ;;  %v6741_v26 = vld [vmem:[#allocation15_spill] sm:$0xff]  ;;  %v6750_v50 = vld [vmem:[#allocation33_spill] sm:$0xff] }
 0x532   :  { %4940 = vmatmul.mubr.bf16.vlgmr.msra.gmra.mxu1 %v2654_v36  ;;  %4944 = vmatpush3.msra.mxu0 %v5703_v19  ;;  %v2652_v14 = vpack.c.bf16 %v2636_v5, %v2635_v0  ;;  %v6751_v11 = vld [vmem:[#allocation35_spill] sm:$0xff]  ;;  %v6752_v39 = vld [vmem:[#allocation37_spill] sm:$0xff] }
 0x533   :  { %4979 = vmatpush3.msra.mxu1 %v6739_v10  ;;  %4945 = vmatprep.subr.mxu0 %v6713_v21  ;;  %v6753_v27 = vld [vmem:[#allocation39_spill] sm:$0xff] }
 0x534   :  { %4980 = vmatprep.subr.mxu1 %v6713_v21  ;;  %4946 = vmatpush3.msra.mxu0 %v5711_v23 }
 0x535   :  { %4981 = vmatpush3.msra.mxu1 %v6740_v54  ;;  %4947 = vmatprep.subr.mxu0 %v6713_v21 }
 0x536   :  { %4982 = vmatprep.subr.mxu1 %v6713_v21  ;;  %4948 = vmatpush3.msra.mxu0 %v5724_v29 }
 0x537   :  { %4983 = vmatpush3.msra.mxu1 %v6741_v26  ;;  %4949 = vmatprep.subr.mxu0 %v6713_v21 }
 0x538   :  { %2888 = vmatmul.mubr.bf16.gmra.mxu0 %v2652_v14  ;;  %4984 = vmatprep.subr.mxu1 %v6713_v21 }
 0x539   :  { %4985 = vmatpush3.msra.mxu1 %v6742_v43  ;;  %4950 = vmatpush3.msra.mxu0 %v5739_v58 }
 0x53a   :  { %4986 = vmatprep.subr.mxu1 %v6713_v21  ;;  %4951 = vmatprep.subr.mxu0 %v6713_v21 }
 0x53b   :  { %4987 = vmatpush3.msra.mxu1 %v6743_v32  ;;  %4952 = vmatpush3.msra.mxu0 %v5757_v3 }
 0x53c   :  { %4988 = vmatprep.subr.mxu1 %v6713_v21  ;;  %4953 = vmatprep.subr.mxu0 %v6713_v21 }
 0x53d   :  { %4989 = vmatpush3.msra.mxu1 %v6744_v46  ;;  %4954 = vmatpush3.msra.mxu0 %v5771_v42 }
 0x53e   :  { %4990 = vmatprep.subr.mxu1 %v6713_v21  ;;  %4955 = vmatprep.subr.mxu0 %v6713_v21 }
 0x53f   :  { %4991 = vmatpush3.msra.mxu1 %v6745_v20  ;;  %4956 = vmatpush3.msra.mxu0 %v5789_v31 }
 0x540   :  { %4992 = vmatprep.subr.mxu1 %v6713_v21  ;;  %4957 = vmatprep.subr.mxu0 %v6713_v21 }
 0x541   :  { %4993 = vmatpush3.msra.mxu1 %v6746_v53  ;;  %4958 = vmatpush3.msra.mxu0 %v5809_v45 }
 0x542   :  { %4994 = vmatprep.subr.mxu1 %v6713_v21  ;;  %4959 = vmatprep.subr.mxu0 %v6713_v21 }
 0x543   :  { %4995 = vmatpush3.msra.mxu1 %v6747_v60  ;;  %4960 = vmatpush3.msra.mxu0 %v5828_v52 }
 0x544   :  { %4996 = vmatprep.subr.mxu1 %v6713_v21  ;;  %4961 = vmatprep.subr.mxu0 %v6713_v21 }
 0x545   :  { %4997 = vmatpush3.msra.mxu1 %v6748_v2  ;;  %4962 = vmatpush3.msra.mxu0 %v5850_v15 }
 0x546   :  { %4998 = vmatprep.subr.mxu1 %v6713_v21  ;;  %4963 = vmatprep.subr.mxu0 %v6713_v21 }
 0x547   :  { %4999 = vmatpush3.msra.mxu1 %v6749_v38  ;;  %4964 = vmatpush3.msra.mxu0 %v5864_v24 }
 0x548   :  { %5000 = vmatprep.subr.mxu1 %v6713_v21  ;;  %4965 = vmatprep.subr.mxu0 %v6713_v21 }
 0x549   :  { %5001 = vmatpush3.msra.mxu1 %v6750_v50  ;;  %4966 = vmatpush3.msra.mxu0 %v5883_v37 }
 0x54a   :  { %5002 = vmatprep.subr.mxu1 %v6713_v21  ;;  %4967 = vmatprep.subr.mxu0 %v6713_v21 }
 0x54b   :  { %5003 = vmatpush3.msra.mxu1 %v6751_v11  ;;  %5010 = vmatprep.mubr.msk.f32.mxu1 %vm5235_vm0, %v6713_v21 }
 0x54c   :  { %5004 = vmatprep.subr.mxu1 %v6713_v21  ;;  %4968 = vmatpush3.msra.mxu0 %v5903_v48 }
 0x54d   :  { %5005 = vmatpush3.msra.mxu1 %v6752_v39  ;;  %4969 = vmatprep.subr.mxu0 %v6713_v21 }
 0x54e   :  { %5006 = vmatprep.subr.mxu1 %v6713_v21  ;;  %4970 = vmatpush3.msra.mxu0 %v5922_v61 }
 0x54f   :  { %5007 = vmatpush3.msra.mxu1 %v6753_v27  ;;  %4971 = vmatprep.subr.mxu0 %v6713_v21 }
 0x550   :  { %5008 = vmatprep.subr.mxu1 %v6713_v21  ;;  %4972 = vmatpush3.msra.mxu0 %v5945_v4 }
 0x551   :  { %5009 = vmatpush3.msra.mxu1 %v6754_v18  ;;  %4973 = vmatprep.subr.mxu0 %v6713_v21 }
 0x552   :  { %5048 = vmatprep.subr.mxu1 %v6713_v21  ;;  %4974 = vmatpush3.msra.mxu0 %v5959_v8 }
 0x553   :  { %4975 = vmatprep.mubr.msk.f32.mxu0 %vm5235_vm0, %v6713_v21  ;;  %5013 = vmatprep.subr.mxu0 %v6713_v21 }
 0x5f0   :  { %v4367_v16 = vpop.f32.mrf.mxu0 }
 0x5f2   :  { %v4941_v13 = vpop.f32.mrf.mxu1  ;;  %v4368_v34 = vpop.f32.mrf.mxu0 }
 0x5f3   :  { %v4369_v0 = vadd.f32 %v4368_v34, %v4367_v16 }
 0x5f4   :  { %v2930_v40 = vpop.f32.mrf.mxu1  ;;  %v4370_v6 = vpop.f32.mrf.mxu0 }
 0x5f5   :  { %v6392_v26 = vadd.f32 %v4369_v0, %v2930_v40 }
 0x5f6   :  { %v4942_v36 = vpop.f32.mrf.mxu1  ;;  %v4371_v35 = vpop.f32.mrf.mxu0 }
 0x5f7   :  { %v4372_v17 = vadd.f32 %v4371_v35, %v4370_v6  ;;  %v2954_v60 = vmul.f32 %v6392_v26, %v6392_v26 }
 0x5f8   :  { %v2933_v5 = vpop.f32.mrf.mxu1  ;;  %v4373_v10 = vpop.f32.mrf.mxu0 }
 0x5f9   :  { %v6390_v54 = vadd.f32 %v4372_v17, %v2933_v5 }
 0x5fa   :  { %v4374_v14 = vpop.f32.mrf.mxu0 }
 0x5fb   :  { %v4375_v43 = vadd.f32 %v4374_v14, %v4373_v10  ;;  %v2955_v46 = vmul.f32 %v6390_v54, %v6390_v54  ;;  %v2945_v2 = vadd.f32 %v6390_v54, %v6392_v26 }
 0x5fc   :  { %v4376_v32 = vpop.f32.mrf.mxu0 }
 0x5fd   :  { %v6396_v20 = vadd.f32 %v4941_v13, %v4375_v43  ;;  %v2958_v11 = vadd.f32 %v2955_v46, %v2954_v60 }
 0x5fe   :  { %v4377_v53 = vpop.f32.mrf.mxu0 }
 0x5ff   :  { %v2956_v38 = vmul.f32 %v6396_v20, %v6396_v20  ;;  %v4378_v50 = vadd.f32 %v4377_v53, %v4376_v32  ;;  %v2946_v39 = vadd.f32 %v2945_v2, %v6396_v20 }
 0x601   :  { %v6405_v27 = vadd.f32 %v4942_v36, %v4378_v50  ;;  %v2959_v18 = vadd.f32 %v2958_v11, %v2956_v38 }
 0x603   :  { %v2947_v16 = vadd.f32 %v2946_v39, %v6405_v27  ;;  %v2957_v13 = vmul.f32 %v6405_v27, %v6405_v27 }
 0x605   :  { %v2948_v34 = vrot.slane %v2947_v16, 4  ;;  %v2960_v40 = vadd.f32 %v2959_v18, %v2957_v13  ;;  %v6769_v13 = vld [vmem:[#allocation46_spill] sm:$0xff] }
 0x607   :  { %v2949_v6 = vadd.f32 %v2948_v34, %v2947_v16  ;;  %v2961_v35 = vrot.slane %v2960_v40, 4 }
 0x609   :  { %v2950_v0 = vrot.slane %v2949_v6, 2  ;;  %v2962_v17 = vadd.f32 %v2961_v35, %v2960_v40 }
 0x60b   :  { %v2951_v5 = vadd.f32 %v2950_v0, %v2949_v6  ;;  %v2963_v10 = vrot.slane %v2962_v17, 2 }
 0x60d   :  { %v2952_v14 = vrot.slane %v2951_v5, 1  ;;  %v2964_v43 = vadd.f32 %v2963_v10, %v2962_v17 }
 0x60f   :  { %v2965_v32 = vrot.slane %v2964_v43, 1  ;;  %v2953_v46 = vadd.f32 %v2952_v14, %v2951_v5 }
 0x611   :  { %v2966_v36 = vadd.f32 %v2965_v32, %v2964_v43 }
 0x613   :  { %v2967_v53 = vsel %vm99_vm2, %v2953_v46, %v2966_v36 }
 0x614   :  { %v6411_v60 = vand.u32 4294901760, %v2967_v53 }
 0x616   :  { %v6414_v2 = vsub.f32 %v2967_v53, %v6411_v60  ;;  %5011 = vmatmul.mubr.f32.vlgmr.msra.gmra.mxu1 %v6411_v60  ;;  %v6770_v53 = vld [vmem:[#allocation44_spill] sm:$0xff] }
 0x617   :  { %5049 = vmatpush3.msra.mxu1 %v5703_v19  ;;  %5080 = vmatprep.mubr.msk.f32.mxu1 %vm5235_vm0, %v6713_v21 }
 0x618   :  { %v3051_v38 = vand.u32 4294901760, %v6414_v2  ;;  %5050 = vmatprep.subr.mxu1 %v6713_v21 }
 0x619   :  { %5051 = vmatpush3.msra.mxu1 %v5711_v23 }
 0x61a   :  { %5052 = vmatprep.subr.mxu1 %v6713_v21  ;;  %v3052_v50 = vsub.f32 %v6414_v2, %v3051_v38 }
 0x61b   :  { %5053 = vmatpush3.msra.mxu1 %v5724_v29 }
 0x61c   :  { %5054 = vmatprep.subr.mxu1 %v6713_v21  ;;  %v3053_v11 = vand.u32 4294901760, %v3052_v50 }
 0x61d   :  { %5055 = vmatpush3.msra.mxu1 %v5739_v58 }
 0x61e   :  { %5056 = vmatprep.subr.mxu1 %v6713_v21  ;;  %4976 = vmatmul.mubr.f32.vlgmr.msra.gmra.mxu0 %v3053_v11 }
 0x61f   :  { %5014 = vmatpush3.msra.mxu0 %v5709_v22  ;;  %5057 = vmatpush3.msra.mxu1 %v5757_v3  ;;  %v6757_v22 = vld [vmem:[#allocation19_spill] sm:$0xff] }
 0x620   :  { %5015 = vmatprep.subr.mxu0 %v6713_v21  ;;  %5058 = vmatprep.subr.mxu1 %v6713_v21 }
 0x621   :  { %5016 = vmatpush3.msra.mxu0 %v5722_v28  ;;  %5059 = vmatpush3.msra.mxu1 %v5771_v42  ;;  %v6760_v28 = vld [vmem:[#allocation26_spill] sm:$0xff] }
 0x622   :  { %5017 = vmatprep.subr.mxu0 %v6713_v21  ;;  %5060 = vmatprep.subr.mxu1 %v6713_v21 }
 0x623   :  { %5018 = vmatpush3.msra.mxu0 %v5737_v57  ;;  %5061 = vmatpush3.msra.mxu1 %v5789_v31  ;;  %v6763_v57 = vld [vmem:[#allocation32_spill] sm:$0xff] }
 0x624   :  { %5019 = vmatprep.subr.mxu0 %v6713_v21  ;;  %5062 = vmatprep.subr.mxu1 %v6713_v21 }
 0x625   :  { %5020 = vmatpush3.msra.mxu0 %v5754_v63  ;;  %5063 = vmatpush3.msra.mxu1 %v5809_v45  ;;  %v6766_v63 = vld [vmem:[#allocation36_spill] sm:$0xff] }
 0x626   :  { %5021 = vmatprep.subr.mxu0 %v6713_v21  ;;  %5064 = vmatprep.subr.mxu1 %v6713_v21 }
 0x627   :  { %5022 = vmatpush3.msra.mxu0 %v5775_v9  ;;  %5065 = vmatpush3.msra.mxu1 %v5828_v52 }
 0x628   :  { %5023 = vmatprep.subr.mxu0 %v6713_v21  ;;  %5066 = vmatprep.subr.mxu1 %v6713_v21 }
 0x629   :  { %5024 = vmatpush3.msra.mxu0 %v5787_v30  ;;  %5067 = vmatpush3.msra.mxu1 %v5850_v15 }
 0x62a   :  { %5025 = vmatprep.subr.mxu0 %v6713_v21  ;;  %5068 = vmatprep.subr.mxu1 %v6713_v21 }
 0x62b   :  { %5026 = vmatpush3.msra.mxu0 %v5807_v44  ;;  %5069 = vmatpush3.msra.mxu1 %v5864_v24 }
 0x62c   :  { %5027 = vmatprep.subr.mxu0 %v6713_v21  ;;  %5070 = vmatprep.subr.mxu1 %v6713_v21 }
 0x62d   :  { %5028 = vmatpush3.msra.mxu0 %v5826_v51  ;;  %5071 = vmatpush3.msra.mxu1 %v5883_v37 }
 0x62e   :  { %5029 = vmatprep.subr.mxu0 %v6713_v21  ;;  %5072 = vmatprep.subr.mxu1 %v6713_v21 }
 0x62f   :  { %5030 = vmatpush3.msra.mxu0 %v5846_v12  ;;  %5073 = vmatpush3.msra.mxu1 %v5903_v48 }
 0x630   :  { %5031 = vmatprep.subr.mxu0 %v6713_v21  ;;  %5074 = vmatprep.subr.mxu1 %v6713_v21 }
 0x631   :  { %5032 = vmatpush3.msra.mxu0 %v5869_v49  ;;  %5075 = vmatpush3.msra.mxu1 %v5922_v61 }
 0x632   :  { %5033 = vmatprep.subr.mxu0 %v6713_v21  ;;  %5076 = vmatprep.subr.mxu1 %v6713_v21 }
 0x633   :  { %5034 = vmatpush3.msra.mxu0 %v5881_v7  ;;  %5077 = vmatpush3.msra.mxu1 %v5945_v4 }
 0x634   :  { %5035 = vmatprep.subr.mxu0 %v6713_v21  ;;  %5078 = vmatprep.subr.mxu1 %v6713_v21 }
 0x635   :  { %5036 = vmatpush3.msra.mxu0 %v5901_v47  ;;  %5079 = vmatpush3.msra.mxu1 %v5959_v8 }
 0x636   :  { %5037 = vmatprep.subr.mxu0 %v6713_v21  ;;  %5081 = vmatmul.mubr.f32.vlgmr.msra.gmra.mxu1 %v3051_v38 }
 0x637   :  { %5118 = vmatprep.subr.mxu1 %v6713_v21  ;;  %5038 = vmatpush3.msra.mxu0 %v5920_v55 }
 0x638   :  { %5119 = vmatpush3.msra.mxu1 %v5703_v19  ;;  %5039 = vmatprep.subr.mxu0 %v6713_v21  ;;  %v6756_v19 = vld [vmem:[#allocation18_spill] sm:$0xff] }
 0x639   :  { %5120 = vmatprep.subr.mxu1 %v6713_v21  ;;  %5040 = vmatpush3.msra.mxu0 %v5941_v33 }
 0x63a   :  { %5121 = vmatpush3.msra.mxu1 %v5711_v23  ;;  %5041 = vmatprep.subr.mxu0 %v6713_v21  ;;  %v6758_v23 = vld [vmem:[#allocation22_spill] sm:$0xff] }
 0x63b   :  { %5122 = vmatprep.subr.mxu1 %v6713_v21  ;;  %5042 = vmatpush3.msra.mxu0 %v5964_v59 }
 0x63c   :  { %5123 = vmatpush3.msra.mxu1 %v5724_v29  ;;  %5043 = vmatprep.subr.mxu0 %v6713_v21  ;;  %v6761_v29 = vld [vmem:[#allocation28_spill] sm:$0xff] }
 0x63d   :  { %5124 = vmatprep.subr.mxu1 %v6713_v21  ;;  %5044 = vmatpush3.msra.mxu0 %v5973_v1  ;;  %v6755_v1 = vld [vmem:[#allocation16_spill] sm:$0xff] }
 0x63e   :  { %5045 = vmatprep.mubr.msk.f32.mxu0 %vm5235_vm0, %v6713_v21  ;;  %5125 = vmatpush3.msra.mxu1 %v5739_v58  ;;  %v6764_v58 = vld [vmem:[#allocation34_spill] sm:$0xff] }
 0x63f   :  { %5046 = vmatmul.mubr.f32.vlgmr.msra.gmra.mxu0 %v6414_v2  ;;  %5083 = vmatprep.subr.mxu0 %v6713_v21 }
 0x640   :  { %5126 = vmatprep.subr.mxu1 %v6713_v21  ;;  %5084 = vmatpush3.msra.mxu0 %v5719_v25  ;;  %v6759_v25 = vld [vmem:[#allocation24_spill] sm:$0xff] }
 0x641   :  { %5127 = vmatpush3.msra.mxu1 %v5757_v3  ;;  %5085 = vmatprep.subr.mxu0 %v6713_v21  ;;  %v6767_v3 = vld [vmem:[#allocation38_spill] sm:$0xff] }
 0x642   :  { %5128 = vmatprep.subr.mxu1 %v6713_v21  ;;  %5086 = vmatpush3.msra.mxu0 %v5734_v56  ;;  %v6762_v56 = vld [vmem:[#allocation29_spill] sm:$0xff] }
 0x643   :  { %5129 = vmatpush3.msra.mxu1 %v5771_v42  ;;  %5087 = vmatprep.subr.mxu0 %v6713_v21 }
 0x644   :  { %5130 = vmatprep.subr.mxu1 %v6713_v21  ;;  %5088 = vmatpush3.msra.mxu0 %v5751_v62  ;;  %v6765_v62 = vld [vmem:[#allocation47_spill] sm:$0xff] }
 0x645   :  { %5131 = vmatpush3.msra.mxu1 %v5789_v31  ;;  %5089 = vmatprep.subr.mxu0 %v6713_v21 }
 0x646   :  { %5132 = vmatprep.subr.mxu1 %v6713_v21  ;;  %5090 = vmatpush3.msra.mxu0 %v5769_v41 }
 0x647   :  { %5133 = vmatpush3.msra.mxu1 %v5809_v45  ;;  %5091 = vmatprep.subr.mxu0 %v6713_v21 }
 0x648   :  { %5134 = vmatprep.subr.mxu1 %v6713_v21  ;;  %5092 = vmatpush3.msra.mxu0 %v6755_v1 }
 0x649   :  { %5135 = vmatpush3.msra.mxu1 %v5828_v52  ;;  %5093 = vmatprep.subr.mxu0 %v6713_v21 }
 0x64a   :  { %5136 = vmatprep.subr.mxu1 %v6713_v21  ;;  %5094 = vmatpush3.msra.mxu0 %v6756_v19 }
 0x64b   :  { %5137 = vmatpush3.msra.mxu1 %v5850_v15  ;;  %5095 = vmatprep.subr.mxu0 %v6713_v21 }
 0x64c   :  { %5138 = vmatprep.subr.mxu1 %v6713_v21  ;;  %5096 = vmatpush3.msra.mxu0 %v6757_v22 }
 0x64d   :  { %5139 = vmatpush3.msra.mxu1 %v5864_v24  ;;  %5097 = vmatprep.subr.mxu0 %v6713_v21 }
 0x64e   :  { %5140 = vmatprep.subr.mxu1 %v6713_v21  ;;  %5098 = vmatpush3.msra.mxu0 %v6758_v23 }
 0x64f   :  { %5141 = vmatpush3.msra.mxu1 %v5883_v37  ;;  %5099 = vmatprep.subr.mxu0 %v6713_v21 }
 0x650   :  { %5142 = vmatprep.subr.mxu1 %v6713_v21  ;;  %5100 = vmatpush3.msra.mxu0 %v6759_v25 }
 0x651   :  { %5143 = vmatpush3.msra.mxu1 %v5903_v48  ;;  %5101 = vmatprep.subr.mxu0 %v6713_v21 }
 0x652   :  { %5144 = vmatprep.subr.mxu1 %v6713_v21  ;;  %5102 = vmatpush3.msra.mxu0 %v6760_v28 }
 0x653   :  { %5145 = vmatpush3.msra.mxu1 %v5922_v61  ;;  %5103 = vmatprep.subr.mxu0 %v6713_v21 }
 0x654   :  { %5146 = vmatprep.subr.mxu1 %v6713_v21  ;;  %5104 = vmatpush3.msra.mxu0 %v6761_v29 }
 0x655   :  { %5147 = vmatpush3.msra.mxu1 %v5945_v4  ;;  %5105 = vmatprep.subr.mxu0 %v6713_v21 }
 0x656   :  { %5148 = vmatprep.subr.mxu1 %v6713_v21  ;;  %5106 = vmatpush3.msra.mxu0 %v6762_v56 }
 0x657   :  { %5149 = vmatpush3.msra.mxu1 %v5959_v8  ;;  %5150 = vmatprep.mubr.msk.f32.mxu1 %vm5235_vm0, %v6713_v21  ;;  %v6768_v8 = vld [vmem:[#allocation43_spill] sm:$0xff] }
 0x658   :  { %5107 = vmatprep.subr.mxu0 %v6713_v21  ;;  %5151 = vmatmul.mubr.f32.vlgmr.msra.gmra.mxu1 %v6411_v60 }
 0x659   :  { %5108 = vmatpush3.msra.mxu0 %v6763_v57  ;;  %5115 = vmatprep.mubr.msk.f32.mxu0 %vm5235_vm0, %v6713_v21 }
 0x65a   :  { %5109 = vmatprep.subr.mxu0 %v6713_v21  ;;  %5158 = vmatprep.subr.mxu1 %v6713_v21 }
 0x65b   :  { %5110 = vmatpush3.msra.mxu0 %v6764_v58  ;;  %5159 = vmatpush3.msra.mxu1 %v6765_v62 }
 0x65c   :  { %5111 = vmatprep.subr.mxu0 %v6713_v21  ;;  %5160 = vmatprep.mubr.msk.f32.mxu1 %vm5235_vm0, %v6713_v21 }
 0x65d   :  { %5112 = vmatpush3.msra.mxu0 %v6766_v63  ;;  %5168 = vmatprep.subr.mxu1 %v6713_v21 }
 0x65e   :  { %5113 = vmatprep.subr.mxu0 %v6713_v21 }
 0x65f   :  { %5114 = vmatpush3.msra.mxu0 %v6767_v3 }
 0x660   :  { %5116 = vmatmul.mubr.f32.vlgmr.msra.gmra.mxu0 %v6411_v60  ;;  %5153 = vmatprep.subr.mxu0 %v6713_v21  ;;  %v6771_v60 = vld [vmem:[#allocation45_spill] sm:$0xff] }
 0x661   :  { %5154 = vmatpush3.msra.mxu0 %v6768_v8  ;;  %5155 = vmatprep.mubr.msk.f32.mxu0 %vm5235_vm0, %v6713_v21 }
 0x662   :  { %5163 = vmatprep.subr.mxu0 %v6713_v21 }
 0x6d6   :  { %v3206_v41 = vpop.f32.mrf.mxu1 }
 0x6d8   :  { %v5012_v42 = vpop.f32.mrf.mxu1 }
 0x6de   :  { %v3055_v9 = vpop.f32.mrf.mxu0 }
 0x6df   :  { %v3207_v12 = vadd.f32 %v3206_v41, %v3055_v9  ;;  %v6773_v41 = vld [vmem:[#allocation4_spill] sm:$0xff] }
 0x6e0   :  { %v4977_v30 = vpop.f32.mrf.mxu0 }
 0x6f6   :  { %v3399_v31 = vpop.f32.mrf.mxu1 }
 0x6f8   :  { %v5082_v44 = vpop.f32.mrf.mxu1 }
 0x6ff   :  { %v3310_v45 = vpop.f32.mrf.mxu0 }
 0x700   :  { %v3311_v24 = vadd.f32 %v3310_v45, %v3207_v12 }
 0x701   :  { %v5047_v51 = vpop.f32.mrf.mxu0 }
 0x702   :  { %v3400_v49 = vadd.f32 %v3399_v31, %v3311_v24 }
 0x718   :  { %v3605_v52 = vpop.f32.mrf.mxu1 }
 0x71a   :  { %v5152_v15 = vpop.f32.mrf.mxu1 }
 0x720   :  { %v3518_v59 = vpop.f32.mrf.mxu0 }
 0x721   :  { %v3519_v7 = vadd.f32 %v3518_v59, %v3400_v49 }
 0x722   :  { %v5117_v37 = vpop.f32.mrf.mxu0 }
 0x723   :  { %v3606_v33 = vadd.f32 %v3605_v52, %v3519_v7 }
 0x725   :  { %v3609_v47 = vmul.f32 0.001953125, %v3606_v33 }
 0x727   :  { %v3610_v48 = vmul.f32 %v3609_v47, %v3609_v47 }
 0x729   :  { %v3612_v55 = vrot.slane %v3610_v48, 7 }
 0x72b   :  { %v3614_v61 = vsub.f32 %v3609_v47, %v3612_v55 }
 0x72d   :  { %v3615_v4 = vmax.f32 %v3614_v61, 0.0 }
 0x72f   :  { %v3616_v39 = vadd.f32 1e-05, %v3615_v4 }
 0x731   :  { %5231 = vrsqrt.f32 %v3616_v39 }
 0x73e   :  { %v5232_v18 = vpop.eup %5231 }
 0x73f   :  { %v3619_v16 = vrot.slane %v5232_v18, 5 }
 0x741   :  { %v3621_v34 = vmul.f32 %v6769_v13, %v3619_v16 }
 0x743   :  { %v3623_v40 = vrot.slane %v3621_v34, 4 }
 0x745   :  { %v3625_v6 = vmul.f32 %v3623_v40, %v3609_v47 }
 0x747   :  { %v3627_v35 = vrot.slane %v3625_v6, 3 }
 0x749   :  { %v3629_v0 = vsub.f32 %v6769_v13, %v3627_v35 }
 0x74b   :  { %v3631_v17 = vrot.slane %v3629_v0, 4 }
 0x74d   :  { %v3633_v5 = vsel %vm99_vm2, %v3623_v40, %v3631_v17 }
 0x74e   :  { %v3635_v10 = vsel %vm2155_vm7, %v3633_v5, 0 }
 0x74f   :  { %v3703_v14 = vand.u32 4294901760, %v3635_v10 }
 0x751   :  { %v3704_v43 = vsub.f32 %v3635_v10, %v3703_v14  ;;  %5161 = vmatmul.mubr.f32.vlgmr.msra.gmra.mxu1 %v3703_v14 }
 0x752   :  { %5169 = vmatpush3.msra.mxu1 %v6768_v8  ;;  %5170 = vmatprep.mubr.msk.f32.mxu1 %vm5235_vm0, %v6713_v21 }
 0x753   :  { %v3705_v32 = vand.u32 4294901760, %v3704_v43  ;;  %5178 = vmatprep.subr.mxu1 %v6713_v21 }
 0x755   :  { %5171 = vmatmul.mubr.f32.vlgmr.msra.gmra.mxu1 %v3705_v32  ;;  %v3706_v46 = vsub.f32 %v3704_v43, %v3705_v32 }
 0x756   :  { %5179 = vmatpush3.msra.mxu1 %v6768_v8  ;;  %5180 = vmatprep.mubr.msk.f32.mxu1 %vm5235_vm0, %v6713_v21  ;;  %v6772_v8 = vld [vmem:[#allocation3_spill] sm:$0xff] }
 0x757   :  { %v3707_v36 = vand.u32 4294901760, %v3706_v46 }
 0x759   :  { %5156 = vmatmul.mubr.f32.vlgmr.msra.gmra.mxu0 %v3707_v36  ;;  %5181 = vmatmul.mubr.f32.vlgmr.msra.gmra.mxu1 %v3703_v14 }
 0x75a   :  { %5164 = vmatpush3.msra.mxu0 %v6770_v53  ;;  %5165 = vmatprep.mubr.msk.f32.mxu0 %vm5235_vm0, %v6713_v21 }
 0x75b   :  { %5173 = vmatprep.subr.mxu0 %v6713_v21 }
 0x75d   :  { %5166 = vmatmul.mubr.f32.vlgmr.msra.gmra.mxu0 %v3704_v43 }
 0x75e   :  { %5174 = vmatpush3.msra.mxu0 %v6771_v60  ;;  %5175 = vmatprep.mubr.msk.f32.mxu0 %vm5235_vm0, %v6713_v21 }
 0x761   :  { %5176 = vmatmul.mubr.f32.vlgmr.msra.gmra.mxu0 %v3703_v14 }
 0x811   :  { %v3785_v2 = vpop.f32.mrf.mxu1 }
 0x813   :  { %v5162_v38 = vpop.f32.mrf.mxu1 }
 0x815   :  { %v3933_v50 = vpop.f32.mrf.mxu1 }
 0x817   :  { %v5172_v11 = vpop.f32.mrf.mxu1 }
 0x819   :  { %v3709_v1 = vpop.f32.mrf.mxu0  ;;  %v4079_v19 = vpop.f32.mrf.mxu1 }
 0x81a   :  { %v3786_v25 = vadd.f32 %v3785_v2, %v3709_v1 }
 0x81b   :  { %v5157_v22 = vpop.f32.mrf.mxu0  ;;  %v5182_v23 = vpop.f32.mrf.mxu1 }
 0x81d   :  { %v3859_v28 = vpop.f32.mrf.mxu0 }
 0x81e   :  { %v3860_v29 = vadd.f32 %v3859_v28, %v3786_v25 }
 0x81f   :  { %v5167_v56 = vpop.f32.mrf.mxu0 }
 0x820   :  { %v3934_v57 = vadd.f32 %v3933_v50, %v3860_v29 }
 0x821   :  { %v4007_v58 = vpop.f32.mrf.mxu0 }
 0x822   :  { %v4008_v62 = vadd.f32 %v4007_v58, %v3934_v57 }
 0x823   :  { %v5177_v63 = vpop.f32.mrf.mxu0 }
 0x824   :  { %v4080_v3 = vadd.f32 %v4079_v19, %v4008_v62 }
 0x826   :  { %v4086_v21 = vrot.slane %v4080_v3, %v6772_v8  ;;  %v4094_v42 = vrot.slane %v4080_v3, %v6773_v41 }
 0x828   :  { %v4087_v9 = vmul.f32 %v4086_v21, %v6392_v26  ;;  %v4088_v30 = vmul.f32 %v4086_v21, %v6390_v54  ;;  %v4089_v31 = vmul.f32 %v4086_v21, %v6396_v20  ;;  %v4090_v44 = vmul.f32 %v4086_v21, %v6405_v27 }
 0x82a   :  { %v4095_v45 = vadd.f32 %v4094_v42, %v4087_v9  ;;  %v4096_v51 = vadd.f32 %v4094_v42, %v4088_v30  ;;  %v4097_v52 = vadd.f32 %v4094_v42, %v4089_v31  ;;  %v4098_v12 = vadd.f32 %v4094_v42, %v4090_v44 }
 0x82c   :  { %v4099_v15 = vmax.f32 %v4095_v45, 0.0  ;;  %v4100_v24 = vmax.f32 %v4096_v51, 0.0  ;;  %v4101_v49 = vmax.f32 %v4097_v52, 0.0  ;;  %v4102_v59 = vmax.f32 %v4098_v12, 0.0 }
 0x82e   :  { %4103 = vst [vmem:[%s6611_s9] sm:$0xff] %v4099_v15  ;;  %4104 = vst [vmem:[%s6611_s9 + $0x8] sm:$0xff] %v4100_v24 }
 0x82f   :  { %4105 = vst [vmem:[%s6611_s9 + $0x10] sm:$0xff] %v4101_v49  ;;  %4106 = vst [vmem:[%s6611_s9 + $0x18] sm:$0xff] %v4102_v59 }

</bundles_post_ra>
